<compile_context>
chip_gen: v5e
topology: v5e:2x2
jax: 0.10.0
libtpu: 0.0.40
codegen_flags: <defaults>
</compile_context>

<pallas_src>
import math

import jax
import jax.numpy as jnp
from jax.experimental import pallas as pl
from jax.experimental.pallas import tpu as pltpu  # noqa: F401  (TPU backend)

# ---- small config consistent with the CATE Encoder hyper-parameters ----
D_MODEL = 32
N_HEADS = 4
D_HEAD = D_MODEL // N_HEADS
D_FF = 64
N_LAYERS = 2
VOCAB = 8
SEQ = 8
BATCH = 2
LN_EPS = 1e-5
NEG_INF = -1e9


def _graph_encoder_kernel(tok_ref, bias_ref, emb_ref,
                          wq_ref, bq_ref, wk_ref, bk_ref, wv_ref, bv_ref,
                          wo_ref, bo_ref, g1_ref, be1_ref,
                          w1_ref, b1_ref, w2_ref, b2_ref,
                          g2_ref, be2_ref, out_ref):
    B, S, _ = tok_ref.shape
    V, D = emb_ref.shape
    H = N_HEADS
    BH = B * H

    # ---- op embedding as a one-hot matmul (fused gather) ----
    iota = jax.lax.broadcasted_iota(jnp.int32, (B, S, V), 2)
    onehot = (tok_ref[...] == iota).astype(jnp.float32)               # (B,S,V)
    emb_b = jnp.broadcast_to(emb_ref[...][None], (B, V, D))
    h = jnp.einsum('bsv,bvd->bsd', onehot, emb_b,
                   preferred_element_type=jnp.float32)                # (B,S,D)

    bias = bias_ref[...]            # (B*H,S,S) additive mask bias, shared by all layers

    def layer_norm(y, g, b):
        mu = jnp.mean(y, axis=-1, keepdims=True)
        var = jnp.mean(jnp.square(y - mu), axis=-1, keepdims=True)    # biased variance
        return (y - mu) * jax.lax.rsqrt(var + LN_EPS) * g + b

    outs = []
    for l in range(N_LAYERS):                                         # static unroll
        # broadcast activations over heads: (B,S,D) -> (B*H,S,D), leading dims only
        xh = jnp.broadcast_to(h[:, None], (B, H, S, D)).reshape(BH, S, D)

        q = jnp.einsum('bsd,bde->bse', xh, wq_ref[l],
                       preferred_element_type=jnp.float32) + bq_ref[l]   # (B*H,S,Dh)
        k = jnp.einsum('bsd,bde->bse', xh, wk_ref[l],
                       preferred_element_type=jnp.float32) + bk_ref[l]
        v = jnp.einsum('bsd,bde->bse', xh, wv_ref[l],
                       preferred_element_type=jnp.float32) + bv_ref[l]

        # scaled dot-product attention (scale folded into wq/bq), head-batched
        s = jnp.einsum('bqe,bke->bqk', q, k,
                       preferred_element_type=jnp.float32) + bias        # (B*H,S,S)
        s = s - jnp.max(s, axis=-1, keepdims=True)
        e = jnp.exp(s)
        p = e * pl.reciprocal(jnp.sum(e, axis=-1, keepdims=True), approx=True)

        ctx = jnp.einsum('bqk,bke->bqe', p, v,
                         preferred_element_type=jnp.float32)             # (B*H,S,Dh)
        o_h = jnp.einsum('bqe,bed->bqd', ctx, wo_ref[l],
                         preferred_element_type=jnp.float32)             # (B*H,S,D)
        attn = jnp.sum(o_h.reshape(B, H, S, D), axis=1) + bo_ref[l]      # (B,S,D)

        h1 = layer_norm(h + attn, g1_ref[l], be1_ref[l])

        f = jnp.einsum('bsd,bdf->bsf', h1, w1_ref[l],
                       preferred_element_type=jnp.float32) + b1_ref[l]
        f = jnp.maximum(f, 0.0)
        f = jnp.einsum('bsf,bfd->bsd', f, w2_ref[l],
                       preferred_element_type=jnp.float32) + b2_ref[l]

        h = layer_norm(h1 + f, g2_ref[l], be2_ref[l])
        outs.append(h)

    # torch.cat(hs, dim=-1), written once directly from the kernel
    out_ref[...] = jnp.concatenate(outs, axis=-1)


_PARAM_ORDER = ("wq", "bq", "wk", "bk", "wv", "bv", "wo", "bo",
                "g1", "be1", "w1", "b1", "w2", "b2", "g2", "be2")


def _pack_params(params, batch):
    """Head-split, scale-fold and layer-stack the per-layer weights (plain JAX)."""
    H, Dh = N_HEADS, D_HEAD
    scale = 1.0 / math.sqrt(Dh)

    def tile(w, n):                       # (a, ...) -> (n, a, ...) replicated
        return jnp.broadcast_to(w[None], (n,) + w.shape)

    def tile_merge(w_h):                  # (H, a, b) -> (batch*H, a, b)
        return tile(w_h, batch).reshape((batch * H,) + w_h.shape[1:])

    stacks = {k: [] for k in _PARAM_ORDER}
    for p in params["layers"]:
        wq_h = p["wq"].reshape(D_MODEL, H, Dh).transpose(1, 0, 2) * scale  # (H,D,Dh)
        wk_h = p["wk"].reshape(D_MODEL, H, Dh).transpose(1, 0, 2)
        wv_h = p["wv"].reshape(D_MODEL, H, Dh).transpose(1, 0, 2)
        wo_h = p["wo"].reshape(H, Dh, D_MODEL)                             # (H,Dh,D)
        bq_h = p["bq"].reshape(H, 1, Dh) * scale
        bk_h = p["bk"].reshape(H, 1, Dh)
        bv_h = p["bv"].reshape(H, 1, Dh)

        stacks["wq"].append(tile_merge(wq_h)); stacks["bq"].append(tile_merge(bq_h))
        stacks["wk"].append(tile_merge(wk_h)); stacks["bk"].append(tile_merge(bk_h))
        stacks["wv"].append(tile_merge(wv_h)); stacks["bv"].append(tile_merge(bv_h))
        stacks["wo"].append(tile_merge(wo_h)); stacks["bo"].append(p["bo"])
        stacks["g1"].append(p["g1"]); stacks["be1"].append(p["be1"])
        stacks["w1"].append(tile(p["w1"], batch)); stacks["b1"].append(p["b1"])
        stacks["w2"].append(tile(p["w2"], batch)); stacks["b2"].append(p["b2"])
        stacks["g2"].append(p["g2"]); stacks["be2"].append(p["be2"])

    return [jnp.stack(stacks[k], axis=0) for k in _PARAM_ORDER]


def graph_encoder_forward(params, tokens, mask):
    """GraphEncoder.forward: concat of per-layer hidden states, shape (B,S,L*D)."""
    B, S = tokens.shape

    # additive attention bias from the (B,S,S) mask, computed once for all
    # layers/heads: masked_fill(mask==0, -1e9) expressed as "+(-1e9)"
    bias = jnp.where(mask == 0.0, NEG_INF, 0.0).astype(jnp.float32)       # (B,S,S)
    bias = jnp.broadcast_to(bias[:, None], (B, N_HEADS, S, S)).reshape(B * N_HEADS, S, S)

    tok = tokens.astype(jnp.int32).reshape(B, S, 1)
    packed = _pack_params(params, B)

    # single grid-less pallas_call: every operand lives entirely in VMEM
    return pl.pallas_call(
        _graph_encoder_kernel,
        out_shape=jax.ShapeDtypeStruct((B, S, N_LAYERS * D_MODEL), jnp.float32),
    )(tok, bias, params["emb"], *packed)


def init_params(key):
    k_emb, k_layers = jax.random.split(key)
    # nn.Embedding default init: N(0, 1)
    emb = jax.random.normal(k_emb, (VOCAB, D_MODEL), jnp.float32)

    def lin(k, fan_in, shape):
        bound = 1.0 / math.sqrt(fan_in)
        return jax.random.uniform(k, shape, jnp.float32, -bound, bound)

    layers = []
    for i in range(N_LAYERS):
        ks = jax.random.split(jax.random.fold_in(k_layers, i), 12)
        layers.append({
            "wq": lin(ks[0], D_MODEL, (D_MODEL, D_MODEL)),
            "bq": lin(ks[1], D_MODEL, (1, D_MODEL)),
            "wk": lin(ks[2], D_MODEL, (D_MODEL, D_MODEL)),
            "bk": lin(ks[3], D_MODEL, (1, D_MODEL)),
            "wv": lin(ks[4], D_MODEL, (D_MODEL, D_MODEL)),
            "bv": lin(ks[5], D_MODEL, (1, D_MODEL)),
            "wo": lin(ks[6], D_MODEL, (D_MODEL, D_MODEL)),
            "bo": lin(ks[7], D_MODEL, (1, D_MODEL)),
            "g1": jnp.ones((1, D_MODEL), jnp.float32),
            "be1": jnp.zeros((1, D_MODEL), jnp.float32),
            "w1": lin(ks[8], D_MODEL, (D_MODEL, D_FF)),
            "b1": lin(ks[9], D_MODEL, (1, D_FF)),
            "w2": lin(ks[10], D_FF, (D_FF, D_MODEL)),
            "b2": lin(ks[11], D_FF, (1, D_MODEL)),
            "g2": jnp.ones((1, D_MODEL), jnp.float32),
            "be2": jnp.zeros((1, D_MODEL), jnp.float32),
        })
    return {"emb": emb, "layers": layers}


# ---- pure-JAX reference for correctness checking ----
def _ref_layer(x, mask, p):
    def ln(h, g, b):
        mu = h.mean(-1, keepdims=True)
        var = ((h - mu) ** 2).mean(-1, keepdims=True)
        return (h - mu) / jnp.sqrt(var + LN_EPS) * g + b

    B, S, D = x.shape
    q = x @ p["wq"] + p["bq"][0]
    k = x @ p["wk"] + p["bk"][0]
    v = x @ p["wv"] + p["bv"][0]
    qh = q.reshape(B, S, N_HEADS, D_HEAD).transpose(0, 2, 1, 3)
    kh = k.reshape(B, S, N_HEADS, D_HEAD).transpose(0, 2, 1, 3)
    vh = v.reshape(B, S, N_HEADS, D_HEAD).transpose(0, 2, 1, 3)
    s = jnp.einsum("bhqd,bhkd->bhqk", qh, kh) / math.sqrt(D_HEAD)
    s = jnp.where(mask[:, None] == 0.0, NEG_INF, s)
    a = jax.nn.softmax(s, axis=-1)
    ctx = jnp.einsum("bhqk,bhkd->bhqd", a, vh).transpose(0, 2, 1, 3).reshape(B, S, D)
    h1 = ln(x + ctx @ p["wo"] + p["bo"][0], p["g1"][0], p["be1"][0])
    f = jnp.maximum(h1 @ p["w1"] + p["b1"][0], 0.0) @ p["w2"] + p["b2"][0]
    return ln(h1 + f, p["g2"][0], p["be2"][0])


def _ref_forward(params, tokens, mask):
    h = params["emb"][tokens]
    hs = []
    for lp in params["layers"]:
        h = _ref_layer(h, mask, lp)
        hs.append(h)
    return jnp.concatenate(hs, axis=-1)


if __name__ == "__main__":
    key = jax.random.PRNGKey(0)
    k_param, k_tok = jax.random.split(key)
    params = init_params(k_param)

    tokens = jax.random.randint(k_tok, (BATCH, SEQ), 0, VOCAB, dtype=jnp.int32)
    # padding mask: batch 0 fully valid, batch 1 has the last 2 positions padded
    valid = jnp.array([[1.0] * SEQ,
                       [1.0] * (SEQ - 2) + [0.0, 0.0]], dtype=jnp.float32)
    mask = jnp.repeat(valid[:, None, :], SEQ, axis=1)          # (B,S,S)

    fwd = jax.jit(graph_encoder_forward)
    out = jax.block_until_ready(fwd(params, tokens, mask))
    assert out.shape == (BATCH, SEQ, N_LAYERS * D_MODEL)

    ref = _ref_forward(params, tokens, mask)
    # tolerance is loosened only for the EUP approximate-reciprocal softmax
    # denominator (pl.reciprocal(approx=True)); the math is otherwise exact.
    assert jnp.allclose(out, ref, atol=2e-2, rtol=2e-2), "mismatch vs JAX reference"

    print("KERNEL_OK")
</pallas_src>

<mosaic_0001>
module attributes {stable_mosaic.version = 11 : i64} {
  func.func @_graph_encoder_kernel(%arg0: memref<2x8x1xi32, #tpu.memory_space<vmem>>, %arg1: memref<8x8x8xf32, #tpu.memory_space<vmem>>, %arg2: memref<8x32xf32, #tpu.memory_space<vmem>>, %arg3: memref<2x8x32x8xf32, #tpu.memory_space<vmem>>, %arg4: memref<2x8x1x8xf32, #tpu.memory_space<vmem>>, %arg5: memref<2x8x32x8xf32, #tpu.memory_space<vmem>>, %arg6: memref<2x8x1x8xf32, #tpu.memory_space<vmem>>, %arg7: memref<2x8x32x8xf32, #tpu.memory_space<vmem>>, %arg8: memref<2x8x1x8xf32, #tpu.memory_space<vmem>>, %arg9: memref<2x8x8x32xf32, #tpu.memory_space<vmem>>, %arg10: memref<2x1x32xf32, #tpu.memory_space<vmem>>, %arg11: memref<2x1x32xf32, #tpu.memory_space<vmem>>, %arg12: memref<2x1x32xf32, #tpu.memory_space<vmem>>, %arg13: memref<2x2x32x64xf32, #tpu.memory_space<vmem>>, %arg14: memref<2x1x64xf32, #tpu.memory_space<vmem>>, %arg15: memref<2x2x64x32xf32, #tpu.memory_space<vmem>>, %arg16: memref<2x1x32xf32, #tpu.memory_space<vmem>>, %arg17: memref<2x1x32xf32, #tpu.memory_space<vmem>>, %arg18: memref<2x1x32xf32, #tpu.memory_space<vmem>>, %arg19: memref<2x8x64xf32, #tpu.memory_space<vmem>>) attributes {dimension_semantics = [], scalar_prefetch = 0 : i64, scratch_operands = 0 : i64, tpu.core_type = #tpu.core_type<tc>} {
    %0 = tpu.iota {dimensions = array<i32: 2>} : vector<2x8x8xi32>
    %c0 = arith.constant 0 : index
    %c0_0 = arith.constant 0 : index
    %c0_1 = arith.constant 0 : index
    %1 = vector.load %arg0[%c0, %c0_0, %c0_1] : memref<2x8x1xi32, #tpu.memory_space<vmem>>, vector<2x8x1xi32>
    %2 = vector.broadcast %1 : vector<2x8x1xi32> to vector<2x8x8xi32>
    %3 = arith.cmpi eq, %2, %0 : vector<2x8x8xi32>
    %4 = arith.extui %3 : vector<2x8x8xi1> to vector<2x8x8xi32>
    %5 = arith.sitofp %4 : vector<2x8x8xi32> to vector<2x8x8xf32>
    %c0_2 = arith.constant 0 : index
    %c0_3 = arith.constant 0 : index
    %6 = vector.load %arg2[%c0_2, %c0_3] : memref<8x32xf32, #tpu.memory_space<vmem>>, vector<8x32xf32>
    %7 = vector.shape_cast %6 : vector<8x32xf32> to vector<1x8x32xf32>
    %8 = vector.shape_cast %7 : vector<1x8x32xf32> to vector<1x8x32xf32>
    %9 = vector.broadcast %8 : vector<1x8x32xf32> to vector<2x8x32xf32>
    "tpu.trace_start"() <{level = 10 : i32, message = "bsv,bvd->bsd"}> : () -> ()
    %cst = arith.constant dense<0.000000e+00> : vector<2x8x32xf32>
    %10 = tpu.matmul %5, %9, %cst {dimension_numbers = #tpu.dot_dimension_numbers<[2], [1], [1], [2], [0, 0, 0, 1, 1, 2], [0], [0]>} : vector<2x8x8xf32>, vector<2x8x32xf32>, vector<2x8x32xf32> -> vector<2x8x32xf32>
    "tpu.trace_stop"() : () -> ()
    %c0_4 = arith.constant 0 : index
    %c0_5 = arith.constant 0 : index
    %c0_6 = arith.constant 0 : index
    %11 = vector.load %arg1[%c0_4, %c0_5, %c0_6] : memref<8x8x8xf32, #tpu.memory_space<vmem>>, vector<8x8x8xf32>
    %12 = vector.shape_cast %10 : vector<2x8x32xf32> to vector<2x1x8x32xf32>
    %13 = vector.shape_cast %12 : vector<2x1x8x32xf32> to vector<2x1x8x32xf32>
    %14 = vector.broadcast %13 : vector<2x1x8x32xf32> to vector<2x4x8x32xf32>
    %15 = vector.shape_cast %14 : vector<2x4x8x32xf32> to vector<8x8x32xf32>
    %c0_7 = arith.constant 0 : index
    %c0_8 = arith.constant 0 : index
    %c0_9 = arith.constant 0 : index
    %c0_10 = arith.constant 0 : index
    %16 = vector.load %arg3[%c0_7, %c0_8, %c0_9, %c0_10] : memref<2x8x32x8xf32, #tpu.memory_space<vmem>>, vector<1x8x32x8xf32>
    %17 = vector.shape_cast %16 : vector<1x8x32x8xf32> to vector<8x32x8xf32>
    "tpu.trace_start"() <{level = 10 : i32, message = "bsd,bde->bse"}> : () -> ()
    %cst_11 = arith.constant dense<0.000000e+00> : vector<8x8x8xf32>
    %18 = tpu.matmul %15, %17, %cst_11 {dimension_numbers = #tpu.dot_dimension_numbers<[2], [1], [1], [2], [0, 0, 0, 1, 1, 2], [0], [0]>} : vector<8x8x32xf32>, vector<8x32x8xf32>, vector<8x8x8xf32> -> vector<8x8x8xf32>
    "tpu.trace_stop"() : () -> ()
    %c0_12 = arith.constant 0 : index
    %c0_13 = arith.constant 0 : index
    %c0_14 = arith.constant 0 : index
    %c0_15 = arith.constant 0 : index
    %19 = vector.load %arg4[%c0_12, %c0_13, %c0_14, %c0_15] : memref<2x8x1x8xf32, #tpu.memory_space<vmem>>, vector<1x8x1x8xf32>
    %20 = vector.shape_cast %19 : vector<1x8x1x8xf32> to vector<8x1x8xf32>
    %21 = vector.broadcast %20 : vector<8x1x8xf32> to vector<8x8x8xf32>
    %22 = arith.addf %18, %21 : vector<8x8x8xf32>
    %c0_16 = arith.constant 0 : index
    %c0_17 = arith.constant 0 : index
    %c0_18 = arith.constant 0 : index
    %c0_19 = arith.constant 0 : index
    %23 = vector.load %arg5[%c0_16, %c0_17, %c0_18, %c0_19] : memref<2x8x32x8xf32, #tpu.memory_space<vmem>>, vector<1x8x32x8xf32>
    %24 = vector.shape_cast %23 : vector<1x8x32x8xf32> to vector<8x32x8xf32>
    "tpu.trace_start"() <{level = 10 : i32, message = "bsd,bde->bse"}> : () -> ()
    %cst_20 = arith.constant dense<0.000000e+00> : vector<8x8x8xf32>
    %25 = tpu.matmul %15, %24, %cst_20 {dimension_numbers = #tpu.dot_dimension_numbers<[2], [1], [1], [2], [0, 0, 0, 1, 1, 2], [0], [0]>} : vector<8x8x32xf32>, vector<8x32x8xf32>, vector<8x8x8xf32> -> vector<8x8x8xf32>
    "tpu.trace_stop"() : () -> ()
    %c0_21 = arith.constant 0 : index
    %c0_22 = arith.constant 0 : index
    %c0_23 = arith.constant 0 : index
    %c0_24 = arith.constant 0 : index
    %26 = vector.load %arg6[%c0_21, %c0_22, %c0_23, %c0_24] : memref<2x8x1x8xf32, #tpu.memory_space<vmem>>, vector<1x8x1x8xf32>
    %27 = vector.shape_cast %26 : vector<1x8x1x8xf32> to vector<8x1x8xf32>
    %28 = vector.broadcast %27 : vector<8x1x8xf32> to vector<8x8x8xf32>
    %29 = arith.addf %25, %28 : vector<8x8x8xf32>
    %c0_25 = arith.constant 0 : index
    %c0_26 = arith.constant 0 : index
    %c0_27 = arith.constant 0 : index
    %c0_28 = arith.constant 0 : index
    %30 = vector.load %arg7[%c0_25, %c0_26, %c0_27, %c0_28] : memref<2x8x32x8xf32, #tpu.memory_space<vmem>>, vector<1x8x32x8xf32>
    %31 = vector.shape_cast %30 : vector<1x8x32x8xf32> to vector<8x32x8xf32>
    "tpu.trace_start"() <{level = 10 : i32, message = "bsd,bde->bse"}> : () -> ()
    %cst_29 = arith.constant dense<0.000000e+00> : vector<8x8x8xf32>
    %32 = tpu.matmul %15, %31, %cst_29 {dimension_numbers = #tpu.dot_dimension_numbers<[2], [1], [1], [2], [0, 0, 0, 1, 1, 2], [0], [0]>} : vector<8x8x32xf32>, vector<8x32x8xf32>, vector<8x8x8xf32> -> vector<8x8x8xf32>
    "tpu.trace_stop"() : () -> ()
    %c0_30 = arith.constant 0 : index
    %c0_31 = arith.constant 0 : index
    %c0_32 = arith.constant 0 : index
    %c0_33 = arith.constant 0 : index
    %33 = vector.load %arg8[%c0_30, %c0_31, %c0_32, %c0_33] : memref<2x8x1x8xf32, #tpu.memory_space<vmem>>, vector<1x8x1x8xf32>
    %34 = vector.shape_cast %33 : vector<1x8x1x8xf32> to vector<8x1x8xf32>
    %35 = vector.broadcast %34 : vector<8x1x8xf32> to vector<8x8x8xf32>
    %36 = arith.addf %32, %35 : vector<8x8x8xf32>
    "tpu.trace_start"() <{level = 10 : i32, message = "bqe,bke->bqk"}> : () -> ()
    %cst_34 = arith.constant dense<0.000000e+00> : vector<8x8x8xf32>
    %37 = tpu.matmul %22, %29, %cst_34 {dimension_numbers = #tpu.dot_dimension_numbers<[2], [2], [1], [1], [0, 0, 0, 1, 1, 1], [0], [0]>} : vector<8x8x8xf32>, vector<8x8x8xf32>, vector<8x8x8xf32> -> vector<8x8x8xf32>
    "tpu.trace_stop"() : () -> ()
    %38 = arith.addf %37, %11 : vector<8x8x8xf32>
    %cst_35 = arith.constant dense<0xFF800000> : vector<8x8xf32>
    %39 = vector.multi_reduction <maximumf>, %38, %cst_35 [2] : vector<8x8x8xf32> to vector<8x8xf32>
    %40 = vector.shape_cast %39 : vector<8x8xf32> to vector<8x8x1xf32>
    %41 = vector.broadcast %40 : vector<8x8x1xf32> to vector<8x8x8xf32>
    %42 = arith.subf %38, %41 : vector<8x8x8xf32>
    %43 = math.exp %42 : vector<8x8x8xf32>
    %cst_36 = arith.constant dense<0.000000e+00> : vector<8x8xf32>
    %44 = vector.multi_reduction <add>, %43, %cst_36 [2] : vector<8x8x8xf32> to vector<8x8xf32>
    %45 = vector.shape_cast %44 : vector<8x8xf32> to vector<8x8x1xf32>
    %46 = tpu.reciprocal %45 {approx = true} : vector<8x8x1xf32> -> vector<8x8x1xf32>
    %47 = vector.broadcast %46 : vector<8x8x1xf32> to vector<8x8x8xf32>
    %48 = arith.mulf %43, %47 : vector<8x8x8xf32>
    "tpu.trace_start"() <{level = 10 : i32, message = "bqk,bke->bqe"}> : () -> ()
    %cst_37 = arith.constant dense<0.000000e+00> : vector<8x8x8xf32>
    %49 = tpu.matmul %48, %36, %cst_37 {dimension_numbers = #tpu.dot_dimension_numbers<[2], [1], [1], [2], [0, 0, 0, 1, 1, 2], [0], [0]>} : vector<8x8x8xf32>, vector<8x8x8xf32>, vector<8x8x8xf32> -> vector<8x8x8xf32>
    "tpu.trace_stop"() : () -> ()
    %c0_38 = arith.constant 0 : index
    %c0_39 = arith.constant 0 : index
    %c0_40 = arith.constant 0 : index
    %c0_41 = arith.constant 0 : index
    %50 = vector.load %arg9[%c0_38, %c0_39, %c0_40, %c0_41] : memref<2x8x8x32xf32, #tpu.memory_space<vmem>>, vector<1x8x8x32xf32>
    %51 = vector.shape_cast %50 : vector<1x8x8x32xf32> to vector<8x8x32xf32>
    "tpu.trace_start"() <{level = 10 : i32, message = "bqe,bed->bqd"}> : () -> ()
    %cst_42 = arith.constant dense<0.000000e+00> : vector<8x8x32xf32>
    %52 = tpu.matmul %49, %51, %cst_42 {dimension_numbers = #tpu.dot_dimension_numbers<[2], [1], [1], [2], [0, 0, 0, 1, 1, 2], [0], [0]>} : vector<8x8x8xf32>, vector<8x8x32xf32>, vector<8x8x32xf32> -> vector<8x8x32xf32>
    "tpu.trace_stop"() : () -> ()
    %53 = vector.shape_cast %52 : vector<8x8x32xf32> to vector<2x4x8x32xf32>
    %cst_43 = arith.constant dense<0.000000e+00> : vector<2x8x32xf32>
    %54 = vector.multi_reduction <add>, %53, %cst_43 [1] : vector<2x4x8x32xf32> to vector<2x8x32xf32>
    %c0_44 = arith.constant 0 : index
    %c0_45 = arith.constant 0 : index
    %c0_46 = arith.constant 0 : index
    %55 = vector.load %arg10[%c0_44, %c0_45, %c0_46] : memref<2x1x32xf32, #tpu.memory_space<vmem>>, vector<1x1x32xf32>
    %56 = vector.shape_cast %55 : vector<1x1x32xf32> to vector<1x32xf32>
    %57 = vector.shape_cast %56 : vector<1x32xf32> to vector<1x1x32xf32>
    %58 = vector.broadcast %57 : vector<1x1x32xf32> to vector<2x8x32xf32>
    %59 = arith.addf %54, %58 : vector<2x8x32xf32>
    %60 = arith.addf %10, %59 : vector<2x8x32xf32>
    %c0_47 = arith.constant 0 : index
    %c0_48 = arith.constant 0 : index
    %c0_49 = arith.constant 0 : index
    %61 = vector.load %arg11[%c0_47, %c0_48, %c0_49] : memref<2x1x32xf32, #tpu.memory_space<vmem>>, vector<1x1x32xf32>
    %62 = vector.shape_cast %61 : vector<1x1x32xf32> to vector<1x32xf32>
    %c0_50 = arith.constant 0 : index
    %c0_51 = arith.constant 0 : index
    %c0_52 = arith.constant 0 : index
    %63 = vector.load %arg12[%c0_50, %c0_51, %c0_52] : memref<2x1x32xf32, #tpu.memory_space<vmem>>, vector<1x1x32xf32>
    %64 = vector.shape_cast %63 : vector<1x1x32xf32> to vector<1x32xf32>
    %cst_53 = arith.constant dense<0.000000e+00> : vector<2x8xf32>
    %65 = vector.multi_reduction <add>, %60, %cst_53 [2] : vector<2x8x32xf32> to vector<2x8xf32>
    %66 = vector.shape_cast %65 : vector<2x8xf32> to vector<2x8x1xf32>
    %cst_54 = arith.constant 3.200000e+01 : f32
    %67 = vector.broadcast %cst_54 : f32 to vector<2x8x1xf32>
    %68 = arith.divf %66, %67 : vector<2x8x1xf32>
    %69 = vector.broadcast %68 : vector<2x8x1xf32> to vector<2x8x32xf32>
    %70 = arith.subf %60, %69 : vector<2x8x32xf32>
    %71 = arith.mulf %70, %70 : vector<2x8x32xf32>
    %cst_55 = arith.constant dense<0.000000e+00> : vector<2x8xf32>
    %72 = vector.multi_reduction <add>, %71, %cst_55 [2] : vector<2x8x32xf32> to vector<2x8xf32>
    %73 = vector.shape_cast %72 : vector<2x8xf32> to vector<2x8x1xf32>
    %cst_56 = arith.constant 3.200000e+01 : f32
    %74 = vector.broadcast %cst_56 : f32 to vector<2x8x1xf32>
    %75 = arith.divf %73, %74 : vector<2x8x1xf32>
    %76 = vector.broadcast %68 : vector<2x8x1xf32> to vector<2x8x32xf32>
    %77 = arith.subf %60, %76 : vector<2x8x32xf32>
    %cst_57 = arith.constant 9.99999974E-6 : f32
    %78 = vector.broadcast %cst_57 : f32 to vector<2x8x1xf32>
    %79 = arith.addf %75, %78 : vector<2x8x1xf32>
    %80 = math.rsqrt %79 : vector<2x8x1xf32>
    %81 = vector.broadcast %80 : vector<2x8x1xf32> to vector<2x8x32xf32>
    %82 = arith.mulf %77, %81 : vector<2x8x32xf32>
    %83 = vector.shape_cast %62 : vector<1x32xf32> to vector<1x1x32xf32>
    %84 = vector.broadcast %83 : vector<1x1x32xf32> to vector<2x8x32xf32>
    %85 = arith.mulf %82, %84 : vector<2x8x32xf32>
    %86 = vector.shape_cast %64 : vector<1x32xf32> to vector<1x1x32xf32>
    %87 = vector.broadcast %86 : vector<1x1x32xf32> to vector<2x8x32xf32>
    %88 = arith.addf %85, %87 : vector<2x8x32xf32>
    %c0_58 = arith.constant 0 : index
    %c0_59 = arith.constant 0 : index
    %c0_60 = arith.constant 0 : index
    %c0_61 = arith.constant 0 : index
    %89 = vector.load %arg13[%c0_58, %c0_59, %c0_60, %c0_61] : memref<2x2x32x64xf32, #tpu.memory_space<vmem>>, vector<1x2x32x64xf32>
    %90 = vector.shape_cast %89 : vector<1x2x32x64xf32> to vector<2x32x64xf32>
    "tpu.trace_start"() <{level = 10 : i32, message = "bsd,bdf->bsf"}> : () -> ()
    %cst_62 = arith.constant dense<0.000000e+00> : vector<2x8x64xf32>
    %91 = tpu.matmul %88, %90, %cst_62 {dimension_numbers = #tpu.dot_dimension_numbers<[2], [1], [1], [2], [0, 0, 0, 1, 1, 2], [0], [0]>} : vector<2x8x32xf32>, vector<2x32x64xf32>, vector<2x8x64xf32> -> vector<2x8x64xf32>
    "tpu.trace_stop"() : () -> ()
    %c0_63 = arith.constant 0 : index
    %c0_64 = arith.constant 0 : index
    %c0_65 = arith.constant 0 : index
    %92 = vector.load %arg14[%c0_63, %c0_64, %c0_65] : memref<2x1x64xf32, #tpu.memory_space<vmem>>, vector<1x1x64xf32>
    %93 = vector.shape_cast %92 : vector<1x1x64xf32> to vector<1x64xf32>
    %94 = vector.shape_cast %93 : vector<1x64xf32> to vector<1x1x64xf32>
    %95 = vector.broadcast %94 : vector<1x1x64xf32> to vector<2x8x64xf32>
    %96 = arith.addf %91, %95 : vector<2x8x64xf32>
    %cst_66 = arith.constant 0.000000e+00 : f32
    %97 = vector.broadcast %cst_66 : f32 to vector<2x8x64xf32>
    %98 = arith.maximumf %96, %97 : vector<2x8x64xf32>
    %c0_67 = arith.constant 0 : index
    %c0_68 = arith.constant 0 : index
    %c0_69 = arith.constant 0 : index
    %c0_70 = arith.constant 0 : index
    %99 = vector.load %arg15[%c0_67, %c0_68, %c0_69, %c0_70] : memref<2x2x64x32xf32, #tpu.memory_space<vmem>>, vector<1x2x64x32xf32>
    %100 = vector.shape_cast %99 : vector<1x2x64x32xf32> to vector<2x64x32xf32>
    "tpu.trace_start"() <{level = 10 : i32, message = "bsf,bfd->bsd"}> : () -> ()
    %cst_71 = arith.constant dense<0.000000e+00> : vector<2x8x32xf32>
    %101 = tpu.matmul %98, %100, %cst_71 {dimension_numbers = #tpu.dot_dimension_numbers<[2], [1], [1], [2], [0, 0, 0, 1, 1, 2], [0], [0]>} : vector<2x8x64xf32>, vector<2x64x32xf32>, vector<2x8x32xf32> -> vector<2x8x32xf32>
    "tpu.trace_stop"() : () -> ()
    %c0_72 = arith.constant 0 : index
    %c0_73 = arith.constant 0 : index
    %c0_74 = arith.constant 0 : index
    %102 = vector.load %arg16[%c0_72, %c0_73, %c0_74] : memref<2x1x32xf32, #tpu.memory_space<vmem>>, vector<1x1x32xf32>
    %103 = vector.shape_cast %102 : vector<1x1x32xf32> to vector<1x32xf32>
    %104 = vector.shape_cast %103 : vector<1x32xf32> to vector<1x1x32xf32>
    %105 = vector.broadcast %104 : vector<1x1x32xf32> to vector<2x8x32xf32>
    %106 = arith.addf %101, %105 : vector<2x8x32xf32>
    %107 = arith.addf %88, %106 : vector<2x8x32xf32>
    %c0_75 = arith.constant 0 : index
    %c0_76 = arith.constant 0 : index
    %c0_77 = arith.constant 0 : index
    %108 = vector.load %arg17[%c0_75, %c0_76, %c0_77] : memref<2x1x32xf32, #tpu.memory_space<vmem>>, vector<1x1x32xf32>
    %109 = vector.shape_cast %108 : vector<1x1x32xf32> to vector<1x32xf32>
    %c0_78 = arith.constant 0 : index
    %c0_79 = arith.constant 0 : index
    %c0_80 = arith.constant 0 : index
    %110 = vector.load %arg18[%c0_78, %c0_79, %c0_80] : memref<2x1x32xf32, #tpu.memory_space<vmem>>, vector<1x1x32xf32>
    %111 = vector.shape_cast %110 : vector<1x1x32xf32> to vector<1x32xf32>
    %cst_81 = arith.constant dense<0.000000e+00> : vector<2x8xf32>
    %112 = vector.multi_reduction <add>, %107, %cst_81 [2] : vector<2x8x32xf32> to vector<2x8xf32>
    %113 = vector.shape_cast %112 : vector<2x8xf32> to vector<2x8x1xf32>
    %cst_82 = arith.constant 3.200000e+01 : f32
    %114 = vector.broadcast %cst_82 : f32 to vector<2x8x1xf32>
    %115 = arith.divf %113, %114 : vector<2x8x1xf32>
    %116 = vector.broadcast %115 : vector<2x8x1xf32> to vector<2x8x32xf32>
    %117 = arith.subf %107, %116 : vector<2x8x32xf32>
    %118 = arith.mulf %117, %117 : vector<2x8x32xf32>
    %cst_83 = arith.constant dense<0.000000e+00> : vector<2x8xf32>
    %119 = vector.multi_reduction <add>, %118, %cst_83 [2] : vector<2x8x32xf32> to vector<2x8xf32>
    %120 = vector.shape_cast %119 : vector<2x8xf32> to vector<2x8x1xf32>
    %cst_84 = arith.constant 3.200000e+01 : f32
    %121 = vector.broadcast %cst_84 : f32 to vector<2x8x1xf32>
    %122 = arith.divf %120, %121 : vector<2x8x1xf32>
    %123 = vector.broadcast %115 : vector<2x8x1xf32> to vector<2x8x32xf32>
    %124 = arith.subf %107, %123 : vector<2x8x32xf32>
    %cst_85 = arith.constant 9.99999974E-6 : f32
    %125 = vector.broadcast %cst_85 : f32 to vector<2x8x1xf32>
    %126 = arith.addf %122, %125 : vector<2x8x1xf32>
    %127 = math.rsqrt %126 : vector<2x8x1xf32>
    %128 = vector.broadcast %127 : vector<2x8x1xf32> to vector<2x8x32xf32>
    %129 = arith.mulf %124, %128 : vector<2x8x32xf32>
    %130 = vector.shape_cast %109 : vector<1x32xf32> to vector<1x1x32xf32>
    %131 = vector.broadcast %130 : vector<1x1x32xf32> to vector<2x8x32xf32>
    %132 = arith.mulf %129, %131 : vector<2x8x32xf32>
    %133 = vector.shape_cast %111 : vector<1x32xf32> to vector<1x1x32xf32>
    %134 = vector.broadcast %133 : vector<1x1x32xf32> to vector<2x8x32xf32>
    %135 = arith.addf %132, %134 : vector<2x8x32xf32>
    %136 = vector.shape_cast %135 : vector<2x8x32xf32> to vector<2x1x8x32xf32>
    %137 = vector.shape_cast %136 : vector<2x1x8x32xf32> to vector<2x1x8x32xf32>
    %138 = vector.broadcast %137 : vector<2x1x8x32xf32> to vector<2x4x8x32xf32>
    %139 = vector.shape_cast %138 : vector<2x4x8x32xf32> to vector<8x8x32xf32>
    %c1 = arith.constant 1 : index
    %c0_86 = arith.constant 0 : index
    %c0_87 = arith.constant 0 : index
    %c0_88 = arith.constant 0 : index
    %140 = vector.load %arg3[%c1, %c0_86, %c0_87, %c0_88] : memref<2x8x32x8xf32, #tpu.memory_space<vmem>>, vector<1x8x32x8xf32>
    %141 = vector.shape_cast %140 : vector<1x8x32x8xf32> to vector<8x32x8xf32>
    "tpu.trace_start"() <{level = 10 : i32, message = "bsd,bde->bse"}> : () -> ()
    %cst_89 = arith.constant dense<0.000000e+00> : vector<8x8x8xf32>
    %142 = tpu.matmul %139, %141, %cst_89 {dimension_numbers = #tpu.dot_dimension_numbers<[2], [1], [1], [2], [0, 0, 0, 1, 1, 2], [0], [0]>} : vector<8x8x32xf32>, vector<8x32x8xf32>, vector<8x8x8xf32> -> vector<8x8x8xf32>
    "tpu.trace_stop"() : () -> ()
    %c1_90 = arith.constant 1 : index
    %c0_91 = arith.constant 0 : index
    %c0_92 = arith.constant 0 : index
    %c0_93 = arith.constant 0 : index
    %143 = vector.load %arg4[%c1_90, %c0_91, %c0_92, %c0_93] : memref<2x8x1x8xf32, #tpu.memory_space<vmem>>, vector<1x8x1x8xf32>
    %144 = vector.shape_cast %143 : vector<1x8x1x8xf32> to vector<8x1x8xf32>
    %145 = vector.broadcast %144 : vector<8x1x8xf32> to vector<8x8x8xf32>
    %146 = arith.addf %142, %145 : vector<8x8x8xf32>
    %c1_94 = arith.constant 1 : index
    %c0_95 = arith.constant 0 : index
    %c0_96 = arith.constant 0 : index
    %c0_97 = arith.constant 0 : index
    %147 = vector.load %arg5[%c1_94, %c0_95, %c0_96, %c0_97] : memref<2x8x32x8xf32, #tpu.memory_space<vmem>>, vector<1x8x32x8xf32>
    %148 = vector.shape_cast %147 : vector<1x8x32x8xf32> to vector<8x32x8xf32>
    "tpu.trace_start"() <{level = 10 : i32, message = "bsd,bde->bse"}> : () -> ()
    %cst_98 = arith.constant dense<0.000000e+00> : vector<8x8x8xf32>
    %149 = tpu.matmul %139, %148, %cst_98 {dimension_numbers = #tpu.dot_dimension_numbers<[2], [1], [1], [2], [0, 0, 0, 1, 1, 2], [0], [0]>} : vector<8x8x32xf32>, vector<8x32x8xf32>, vector<8x8x8xf32> -> vector<8x8x8xf32>
    "tpu.trace_stop"() : () -> ()
    %c1_99 = arith.constant 1 : index
    %c0_100 = arith.constant 0 : index
    %c0_101 = arith.constant 0 : index
    %c0_102 = arith.constant 0 : index
    %150 = vector.load %arg6[%c1_99, %c0_100, %c0_101, %c0_102] : memref<2x8x1x8xf32, #tpu.memory_space<vmem>>, vector<1x8x1x8xf32>
    %151 = vector.shape_cast %150 : vector<1x8x1x8xf32> to vector<8x1x8xf32>
    %152 = vector.broadcast %151 : vector<8x1x8xf32> to vector<8x8x8xf32>
    %153 = arith.addf %149, %152 : vector<8x8x8xf32>
    %c1_103 = arith.constant 1 : index
    %c0_104 = arith.constant 0 : index
    %c0_105 = arith.constant 0 : index
    %c0_106 = arith.constant 0 : index
    %154 = vector.load %arg7[%c1_103, %c0_104, %c0_105, %c0_106] : memref<2x8x32x8xf32, #tpu.memory_space<vmem>>, vector<1x8x32x8xf32>
    %155 = vector.shape_cast %154 : vector<1x8x32x8xf32> to vector<8x32x8xf32>
    "tpu.trace_start"() <{level = 10 : i32, message = "bsd,bde->bse"}> : () -> ()
    %cst_107 = arith.constant dense<0.000000e+00> : vector<8x8x8xf32>
    %156 = tpu.matmul %139, %155, %cst_107 {dimension_numbers = #tpu.dot_dimension_numbers<[2], [1], [1], [2], [0, 0, 0, 1, 1, 2], [0], [0]>} : vector<8x8x32xf32>, vector<8x32x8xf32>, vector<8x8x8xf32> -> vector<8x8x8xf32>
    "tpu.trace_stop"() : () -> ()
    %c1_108 = arith.constant 1 : index
    %c0_109 = arith.constant 0 : index
    %c0_110 = arith.constant 0 : index
    %c0_111 = arith.constant 0 : index
    %157 = vector.load %arg8[%c1_108, %c0_109, %c0_110, %c0_111] : memref<2x8x1x8xf32, #tpu.memory_space<vmem>>, vector<1x8x1x8xf32>
    %158 = vector.shape_cast %157 : vector<1x8x1x8xf32> to vector<8x1x8xf32>
    %159 = vector.broadcast %158 : vector<8x1x8xf32> to vector<8x8x8xf32>
    %160 = arith.addf %156, %159 : vector<8x8x8xf32>
    "tpu.trace_start"() <{level = 10 : i32, message = "bqe,bke->bqk"}> : () -> ()
    %cst_112 = arith.constant dense<0.000000e+00> : vector<8x8x8xf32>
    %161 = tpu.matmul %146, %153, %cst_112 {dimension_numbers = #tpu.dot_dimension_numbers<[2], [2], [1], [1], [0, 0, 0, 1, 1, 1], [0], [0]>} : vector<8x8x8xf32>, vector<8x8x8xf32>, vector<8x8x8xf32> -> vector<8x8x8xf32>
    "tpu.trace_stop"() : () -> ()
    %162 = arith.addf %161, %11 : vector<8x8x8xf32>
    %cst_113 = arith.constant dense<0xFF800000> : vector<8x8xf32>
    %163 = vector.multi_reduction <maximumf>, %162, %cst_113 [2] : vector<8x8x8xf32> to vector<8x8xf32>
    %164 = vector.shape_cast %163 : vector<8x8xf32> to vector<8x8x1xf32>
    %165 = vector.broadcast %164 : vector<8x8x1xf32> to vector<8x8x8xf32>
    %166 = arith.subf %162, %165 : vector<8x8x8xf32>
    %167 = math.exp %166 : vector<8x8x8xf32>
    %cst_114 = arith.constant dense<0.000000e+00> : vector<8x8xf32>
    %168 = vector.multi_reduction <add>, %167, %cst_114 [2] : vector<8x8x8xf32> to vector<8x8xf32>
    %169 = vector.shape_cast %168 : vector<8x8xf32> to vector<8x8x1xf32>
    %170 = tpu.reciprocal %169 {approx = true} : vector<8x8x1xf32> -> vector<8x8x1xf32>
    %171 = vector.broadcast %170 : vector<8x8x1xf32> to vector<8x8x8xf32>
    %172 = arith.mulf %167, %171 : vector<8x8x8xf32>
    "tpu.trace_start"() <{level = 10 : i32, message = "bqk,bke->bqe"}> : () -> ()
    %cst_115 = arith.constant dense<0.000000e+00> : vector<8x8x8xf32>
    %173 = tpu.matmul %172, %160, %cst_115 {dimension_numbers = #tpu.dot_dimension_numbers<[2], [1], [1], [2], [0, 0, 0, 1, 1, 2], [0], [0]>} : vector<8x8x8xf32>, vector<8x8x8xf32>, vector<8x8x8xf32> -> vector<8x8x8xf32>
    "tpu.trace_stop"() : () -> ()
    %c1_116 = arith.constant 1 : index
    %c0_117 = arith.constant 0 : index
    %c0_118 = arith.constant 0 : index
    %c0_119 = arith.constant 0 : index
    %174 = vector.load %arg9[%c1_116, %c0_117, %c0_118, %c0_119] : memref<2x8x8x32xf32, #tpu.memory_space<vmem>>, vector<1x8x8x32xf32>
    %175 = vector.shape_cast %174 : vector<1x8x8x32xf32> to vector<8x8x32xf32>
    "tpu.trace_start"() <{level = 10 : i32, message = "bqe,bed->bqd"}> : () -> ()
    %cst_120 = arith.constant dense<0.000000e+00> : vector<8x8x32xf32>
    %176 = tpu.matmul %173, %175, %cst_120 {dimension_numbers = #tpu.dot_dimension_numbers<[2], [1], [1], [2], [0, 0, 0, 1, 1, 2], [0], [0]>} : vector<8x8x8xf32>, vector<8x8x32xf32>, vector<8x8x32xf32> -> vector<8x8x32xf32>
    "tpu.trace_stop"() : () -> ()
    %177 = vector.shape_cast %176 : vector<8x8x32xf32> to vector<2x4x8x32xf32>
    %cst_121 = arith.constant dense<0.000000e+00> : vector<2x8x32xf32>
    %178 = vector.multi_reduction <add>, %177, %cst_121 [1] : vector<2x4x8x32xf32> to vector<2x8x32xf32>
    %c1_122 = arith.constant 1 : index
    %c0_123 = arith.constant 0 : index
    %c0_124 = arith.constant 0 : index
    %179 = vector.load %arg10[%c1_122, %c0_123, %c0_124] : memref<2x1x32xf32, #tpu.memory_space<vmem>>, vector<1x1x32xf32>
    %180 = vector.shape_cast %179 : vector<1x1x32xf32> to vector<1x32xf32>
    %181 = vector.shape_cast %180 : vector<1x32xf32> to vector<1x1x32xf32>
    %182 = vector.broadcast %181 : vector<1x1x32xf32> to vector<2x8x32xf32>
    %183 = arith.addf %178, %182 : vector<2x8x32xf32>
    %184 = arith.addf %135, %183 : vector<2x8x32xf32>
    %c1_125 = arith.constant 1 : index
    %c0_126 = arith.constant 0 : index
    %c0_127 = arith.constant 0 : index
    %185 = vector.load %arg11[%c1_125, %c0_126, %c0_127] : memref<2x1x32xf32, #tpu.memory_space<vmem>>, vector<1x1x32xf32>
    %186 = vector.shape_cast %185 : vector<1x1x32xf32> to vector<1x32xf32>
    %c1_128 = arith.constant 1 : index
    %c0_129 = arith.constant 0 : index
    %c0_130 = arith.constant 0 : index
    %187 = vector.load %arg12[%c1_128, %c0_129, %c0_130] : memref<2x1x32xf32, #tpu.memory_space<vmem>>, vector<1x1x32xf32>
    %188 = vector.shape_cast %187 : vector<1x1x32xf32> to vector<1x32xf32>
    %cst_131 = arith.constant dense<0.000000e+00> : vector<2x8xf32>
    %189 = vector.multi_reduction <add>, %184, %cst_131 [2] : vector<2x8x32xf32> to vector<2x8xf32>
    %190 = vector.shape_cast %189 : vector<2x8xf32> to vector<2x8x1xf32>
    %cst_132 = arith.constant 3.200000e+01 : f32
    %191 = vector.broadcast %cst_132 : f32 to vector<2x8x1xf32>
    %192 = arith.divf %190, %191 : vector<2x8x1xf32>
    %193 = vector.broadcast %192 : vector<2x8x1xf32> to vector<2x8x32xf32>
    %194 = arith.subf %184, %193 : vector<2x8x32xf32>
    %195 = arith.mulf %194, %194 : vector<2x8x32xf32>
    %cst_133 = arith.constant dense<0.000000e+00> : vector<2x8xf32>
    %196 = vector.multi_reduction <add>, %195, %cst_133 [2] : vector<2x8x32xf32> to vector<2x8xf32>
    %197 = vector.shape_cast %196 : vector<2x8xf32> to vector<2x8x1xf32>
    %cst_134 = arith.constant 3.200000e+01 : f32
    %198 = vector.broadcast %cst_134 : f32 to vector<2x8x1xf32>
    %199 = arith.divf %197, %198 : vector<2x8x1xf32>
    %200 = vector.broadcast %192 : vector<2x8x1xf32> to vector<2x8x32xf32>
    %201 = arith.subf %184, %200 : vector<2x8x32xf32>
    %cst_135 = arith.constant 9.99999974E-6 : f32
    %202 = vector.broadcast %cst_135 : f32 to vector<2x8x1xf32>
    %203 = arith.addf %199, %202 : vector<2x8x1xf32>
    %204 = math.rsqrt %203 : vector<2x8x1xf32>
    %205 = vector.broadcast %204 : vector<2x8x1xf32> to vector<2x8x32xf32>
    %206 = arith.mulf %201, %205 : vector<2x8x32xf32>
    %207 = vector.shape_cast %186 : vector<1x32xf32> to vector<1x1x32xf32>
    %208 = vector.broadcast %207 : vector<1x1x32xf32> to vector<2x8x32xf32>
    %209 = arith.mulf %206, %208 : vector<2x8x32xf32>
    %210 = vector.shape_cast %188 : vector<1x32xf32> to vector<1x1x32xf32>
    %211 = vector.broadcast %210 : vector<1x1x32xf32> to vector<2x8x32xf32>
    %212 = arith.addf %209, %211 : vector<2x8x32xf32>
    %c1_136 = arith.constant 1 : index
    %c0_137 = arith.constant 0 : index
    %c0_138 = arith.constant 0 : index
    %c0_139 = arith.constant 0 : index
    %213 = vector.load %arg13[%c1_136, %c0_137, %c0_138, %c0_139] : memref<2x2x32x64xf32, #tpu.memory_space<vmem>>, vector<1x2x32x64xf32>
    %214 = vector.shape_cast %213 : vector<1x2x32x64xf32> to vector<2x32x64xf32>
    "tpu.trace_start"() <{level = 10 : i32, message = "bsd,bdf->bsf"}> : () -> ()
    %cst_140 = arith.constant dense<0.000000e+00> : vector<2x8x64xf32>
    %215 = tpu.matmul %212, %214, %cst_140 {dimension_numbers = #tpu.dot_dimension_numbers<[2], [1], [1], [2], [0, 0, 0, 1, 1, 2], [0], [0]>} : vector<2x8x32xf32>, vector<2x32x64xf32>, vector<2x8x64xf32> -> vector<2x8x64xf32>
    "tpu.trace_stop"() : () -> ()
    %c1_141 = arith.constant 1 : index
    %c0_142 = arith.constant 0 : index
    %c0_143 = arith.constant 0 : index
    %216 = vector.load %arg14[%c1_141, %c0_142, %c0_143] : memref<2x1x64xf32, #tpu.memory_space<vmem>>, vector<1x1x64xf32>
    %217 = vector.shape_cast %216 : vector<1x1x64xf32> to vector<1x64xf32>
    %218 = vector.shape_cast %217 : vector<1x64xf32> to vector<1x1x64xf32>
    %219 = vector.broadcast %218 : vector<1x1x64xf32> to vector<2x8x64xf32>
    %220 = arith.addf %215, %219 : vector<2x8x64xf32>
    %cst_144 = arith.constant 0.000000e+00 : f32
    %221 = vector.broadcast %cst_144 : f32 to vector<2x8x64xf32>
    %222 = arith.maximumf %220, %221 : vector<2x8x64xf32>
    %c1_145 = arith.constant 1 : index
    %c0_146 = arith.constant 0 : index
    %c0_147 = arith.constant 0 : index
    %c0_148 = arith.constant 0 : index
    %223 = vector.load %arg15[%c1_145, %c0_146, %c0_147, %c0_148] : memref<2x2x64x32xf32, #tpu.memory_space<vmem>>, vector<1x2x64x32xf32>
    %224 = vector.shape_cast %223 : vector<1x2x64x32xf32> to vector<2x64x32xf32>
    "tpu.trace_start"() <{level = 10 : i32, message = "bsf,bfd->bsd"}> : () -> ()
    %cst_149 = arith.constant dense<0.000000e+00> : vector<2x8x32xf32>
    %225 = tpu.matmul %222, %224, %cst_149 {dimension_numbers = #tpu.dot_dimension_numbers<[2], [1], [1], [2], [0, 0, 0, 1, 1, 2], [0], [0]>} : vector<2x8x64xf32>, vector<2x64x32xf32>, vector<2x8x32xf32> -> vector<2x8x32xf32>
    "tpu.trace_stop"() : () -> ()
    %c1_150 = arith.constant 1 : index
    %c0_151 = arith.constant 0 : index
    %c0_152 = arith.constant 0 : index
    %226 = vector.load %arg16[%c1_150, %c0_151, %c0_152] : memref<2x1x32xf32, #tpu.memory_space<vmem>>, vector<1x1x32xf32>
    %227 = vector.shape_cast %226 : vector<1x1x32xf32> to vector<1x32xf32>
    %228 = vector.shape_cast %227 : vector<1x32xf32> to vector<1x1x32xf32>
    %229 = vector.broadcast %228 : vector<1x1x32xf32> to vector<2x8x32xf32>
    %230 = arith.addf %225, %229 : vector<2x8x32xf32>
    %231 = arith.addf %212, %230 : vector<2x8x32xf32>
    %c1_153 = arith.constant 1 : index
    %c0_154 = arith.constant 0 : index
    %c0_155 = arith.constant 0 : index
    %232 = vector.load %arg17[%c1_153, %c0_154, %c0_155] : memref<2x1x32xf32, #tpu.memory_space<vmem>>, vector<1x1x32xf32>
    %233 = vector.shape_cast %232 : vector<1x1x32xf32> to vector<1x32xf32>
    %c1_156 = arith.constant 1 : index
    %c0_157 = arith.constant 0 : index
    %c0_158 = arith.constant 0 : index
    %234 = vector.load %arg18[%c1_156, %c0_157, %c0_158] : memref<2x1x32xf32, #tpu.memory_space<vmem>>, vector<1x1x32xf32>
    %235 = vector.shape_cast %234 : vector<1x1x32xf32> to vector<1x32xf32>
    %cst_159 = arith.constant dense<0.000000e+00> : vector<2x8xf32>
    %236 = vector.multi_reduction <add>, %231, %cst_159 [2] : vector<2x8x32xf32> to vector<2x8xf32>
    %237 = vector.shape_cast %236 : vector<2x8xf32> to vector<2x8x1xf32>
    %cst_160 = arith.constant 3.200000e+01 : f32
    %238 = vector.broadcast %cst_160 : f32 to vector<2x8x1xf32>
    %239 = arith.divf %237, %238 : vector<2x8x1xf32>
    %240 = vector.broadcast %239 : vector<2x8x1xf32> to vector<2x8x32xf32>
    %241 = arith.subf %231, %240 : vector<2x8x32xf32>
    %242 = arith.mulf %241, %241 : vector<2x8x32xf32>
    %cst_161 = arith.constant dense<0.000000e+00> : vector<2x8xf32>
    %243 = vector.multi_reduction <add>, %242, %cst_161 [2] : vector<2x8x32xf32> to vector<2x8xf32>
    %244 = vector.shape_cast %243 : vector<2x8xf32> to vector<2x8x1xf32>
    %cst_162 = arith.constant 3.200000e+01 : f32
    %245 = vector.broadcast %cst_162 : f32 to vector<2x8x1xf32>
    %246 = arith.divf %244, %245 : vector<2x8x1xf32>
    %247 = vector.broadcast %239 : vector<2x8x1xf32> to vector<2x8x32xf32>
    %248 = arith.subf %231, %247 : vector<2x8x32xf32>
    %cst_163 = arith.constant 9.99999974E-6 : f32
    %249 = vector.broadcast %cst_163 : f32 to vector<2x8x1xf32>
    %250 = arith.addf %246, %249 : vector<2x8x1xf32>
    %251 = math.rsqrt %250 : vector<2x8x1xf32>
    %252 = vector.broadcast %251 : vector<2x8x1xf32> to vector<2x8x32xf32>
    %253 = arith.mulf %248, %252 : vector<2x8x32xf32>
    %254 = vector.shape_cast %233 : vector<1x32xf32> to vector<1x1x32xf32>
    %255 = vector.broadcast %254 : vector<1x1x32xf32> to vector<2x8x32xf32>
    %256 = arith.mulf %253, %255 : vector<2x8x32xf32>
    %257 = vector.shape_cast %235 : vector<1x32xf32> to vector<1x1x32xf32>
    %258 = vector.broadcast %257 : vector<1x1x32xf32> to vector<2x8x32xf32>
    %259 = arith.addf %256, %258 : vector<2x8x32xf32>
    %260 = tpu.concatenate %135, %259 in 2 : vector<2x8x32xf32>, vector<2x8x32xf32> -> vector<2x8x64xf32>
    %c0_164 = arith.constant 0 : index
    %c0_165 = arith.constant 0 : index
    %c0_166 = arith.constant 0 : index
    %261 = vector.load %arg19[%c0_164, %c0_165, %c0_166] : memref<2x8x64xf32, #tpu.memory_space<vmem>>, vector<2x8x64xf32>
    tpu.vector_store %arg19[%c0_164, %c0_165, %c0_166], %260 {strides = array<i32>} : memref<2x8x64xf32, #tpu.memory_space<vmem>>, vector<2x8x64xf32>,
    return
  }
}

</mosaic_0001>

<bundles_post_ra>
// kernel: graph_encoder_forward.1
= control target key start
LH: loop header
LB: loop body
LE: loop exit
PB: predicated region body
PF: predicated region fallthrough
CT: control target
= control target key end

     0   :  { %s5298_s0 = inlined_call_operand.vmem [shape: s32[2,8,1], index: 0, kind: input, shape index: {}]   ;;  %s5299_s1 = inlined_call_operand.vmem [shape: f32[8,8,8], index: 1, kind: input, shape index: {}]   ;;  %s5300_s2 = inlined_call_operand.vmem [shape: f32[8,32], index: 2, kind: input, shape index: {}]   ;;  %s5301_s3 = inlined_call_operand.vmem [shape: f32[2,8,32,8], index: 3, kind: input, shape index: {}]   ;;  %s5302_s4 = inlined_call_operand.vmem [shape: f32[2,8,1,8], index: 4, kind: input, shape index: {}]   ;;  %s5303_s5 = inlined_call_operand.vmem [shape: f32[2,8,32,8], index: 5, kind: input, shape index: {}]   ;;  %s5304_s6 = inlined_call_operand.vmem [shape: f32[2,8,1,8], index: 6, kind: input, shape index: {}]   ;;  %s5305_s7 = inlined_call_operand.vmem [shape: f32[2,8,32,8], index: 7, kind: input, shape index: {}]   ;;  %s5306_s8 = inlined_call_operand.vmem [shape: f32[2,8,1,8], index: 8, kind: input, shape index: {}]   ;;  %s5307_s9 = inlined_call_operand.vmem [shape: f32[2,8,8,32], index: 9, kind: input, shape index: {}]   ;;  %s5308_s10 = inlined_call_operand.vmem [shape: f32[2,1,32], index: 10, kind: input, shape index: {}]   ;;  %s5309_s11 = inlined_call_operand.vmem [shape: f32[2,1,32], index: 11, kind: input, shape index: {}]   ;;  %s5310_s12 = inlined_call_operand.vmem [shape: f32[2,1,32], index: 12, kind: input, shape index: {}]   ;;  %s5311_s13 = inlined_call_operand.vmem [shape: f32[2,2,32,64], index: 13, kind: input, shape index: {}]   ;;  %s5312_s14 = inlined_call_operand.vmem [shape: f32[2,1,64], index: 14, kind: input, shape index: {}]   ;;  %s5313_s15 = inlined_call_operand.vmem [shape: f32[2,2,64,32], index: 15, kind: input, shape index: {}]   ;;  %s5314_s16 = inlined_call_operand.vmem [shape: f32[2,1,32], index: 16, kind: input, shape index: {}]   ;;  %s5315_s17 = inlined_call_operand.vmem [shape: f32[2,1,32], index: 17, kind: input, shape index: {}]   ;;  %s5316_s18 = inlined_call_operand.vmem [shape: f32[2,1,32], index: 18, kind: input, shape index: {}]   ;;  %s5317_s19 = inlined_call_operand.hbm [shape: f32[2,8,64], index: 19, kind: output, shape index: {}]  }
   0x1   :  { %5321 = sst [smem:[#allocation5_spill]] %s5298_s0 }
   0x2   :  { %5322 = sst [smem:[#allocation6_spill]] %s5299_s1 }
   0x3   :  { %5323 = sst [smem:[#allocation7_spill]] %s5300_s2 }
   0x4   :  { %5324 = sst [smem:[#allocation8_spill]] %s5301_s3 }
   0x5   :  { %s5325_s20 = sld [smem:[#allocation5_spill]]  ;;  %v3883_v1 = vmov 0  }
   0x6   :  { %3704 = vset.pattern.permute.xlu0 %v3883_v1 }
   0xb   :  { %v66_v0 = vld [vmem:[%s5325_s20 + $0x8] sm:$0xff]  ;;  %v65_v2 = vld [vmem:[%s5325_s20] sm:$0xff] }
   0xc   :  { %71 = vperm.xlu0 %3704, %v66_v0  }
  0x14   :  { %68 = vperm.xlu0 %3704, %v65_v2  }
  0x15   :  { %24 = vsyncpa [#allocation3], 0  ;;  %s5326_s23 = sld [smem:[#allocation7_spill]]  ;;  %v63_v10 = vlaneseq  ;;  %vm80_vm0 = vcmask 64512   ;;  %v3884_v13 = vmov 0.0   ;;  %v369_v21 = vld [vmem:[%s5303_s5 + $0x18] sm:$0xff] }
  0x16   :  { %s5327_s3 = sld [smem:[#allocation8_spill]]  ;;  %v373_v22 = vld [vmem:[%s5303_s5 + $0x38] sm:$0xff]  ;;  %v368_v25 = vld [vmem:[%s5303_s5 + $0x10] sm:$0xff]  ;;  %v367_v29 = vld [vmem:[%s5303_s5 + $0x8] sm:$0xff]  ;;  %vm199_vm3 = vcmask 261120   ;;  %vm1651_vm11 = vcmask 523264  }
  0x17   :  { %v64_v11 = vand.u32 127, %v63_v10  ;;  %v372_v26 = vld [vmem:[%s5303_s5 + $0x30] sm:$0xff]  ;;  %v371_v30 = vld [vmem:[%s5303_s5 + $0x28] sm:$0xff]  ;;  %v366_v33 = vld [vmem:[%s5303_s5] sm:$0xff]  ;;  %s5328_s28 = sld [smem:[#allocation6_spill]]  ;;  %s3886_s24 = smov 32  }
  0x18   :  { %v370_v34 = vld [vmem:[%s5303_s5 + $0x20] sm:$0xff]  ;;  %v385_v43 = vld [vmem:[%s5303_s5 + $0x98] sm:$0xff]  ;;  %v384_v46 = vld [vmem:[%s5303_s5 + $0x90] sm:$0xff]  ;;  %s3888_s27 = smov 128  }
  0x19   :  { %v389_v44 = vld [vmem:[%s5303_s5 + $0xb8] sm:$0xff]  ;;  %v388_v47 = vld [vmem:[%s5303_s5 + $0xb0] sm:$0xff]  ;;  %v383_v48 = vld [vmem:[%s5303_s5 + $0x88] sm:$0xff] }
  0x1a   :  { %v387_v49 = vld [vmem:[%s5303_s5 + $0xa8] sm:$0xff]  ;;  %v382_v50 = vld [vmem:[%s5303_s5 + $0x80] sm:$0xff]  ;;  %v593_v55 = vld [vmem:[%s5305_s7 + $0x18] sm:$0xff] }
  0x1b   :  { %v79_v3 = vld [vmem:[%s5326_s23] sm:$0xff]  ;;  %v597_v56 = vld [vmem:[%s5305_s7 + $0x38] sm:$0xff]  ;;  %v592_v59 = vld [vmem:[%s5305_s7 + $0x10] sm:$0xff] }
  0x1c   :  { %122 = vmatpush.msra.mxu1 %v79_v3  ;;  %99 = vmatpush.msra.mxu0 %v79_v3  ;;  %v154_v4 = vld [vmem:[%s5327_s3 + $0x98] sm:$0xff]  ;;  %v153_v6 = vld [vmem:[%s5327_s3 + $0x90] sm:$0xff]  ;;  %v152_v8 = vld [vmem:[%s5327_s3 + $0x88] sm:$0xff] }
  0x1d   :  { %v158_v5 = vld [vmem:[%s5327_s3 + $0xb8] sm:$0xff]  ;;  %298 = vmatpush.msra.mxu2 %v154_v4  ;;  %v157_v7 = vld [vmem:[%s5327_s3 + $0xb0] sm:$0xff]  ;;  %v156_v9 = vld [vmem:[%s5327_s3 + $0xa8] sm:$0xff] }
  0x1e   :  { %318 = vmatpush.msra.mxu3 %v158_v5  ;;  %v151_v17 = vld [vmem:[%s5327_s3 + $0x80] sm:$0xff]  ;;  %v138_v19 = vld [vmem:[%s5327_s3 + $0x18] sm:$0xff]  ;;  %v137_v23 = vld [vmem:[%s5327_s3 + $0x10] sm:$0xff] }
  0x1f   :  { %299 = vmatpush.msra.mxu2 %v153_v6  ;;  %v155_v18 = vld [vmem:[%s5327_s3 + $0xa0] sm:$0xff]  ;;  %v142_v20 = vld [vmem:[%s5327_s3 + $0x38] sm:$0xff]  ;;  %215 = vmatpush.msrb.mxu0 %v138_v19  ;;  %v141_v24 = vld [vmem:[%s5327_s3 + $0x30] sm:$0xff] }
  0x20   :  { %319 = vmatpush.msra.mxu3 %v157_v7  ;;  %235 = vmatpush.msrb.mxu1 %v142_v20  ;;  %v136_v27 = vld [vmem:[%s5327_s3 + $0x8] sm:$0xff]  ;;  %v135_v31 = vld [vmem:[%s5327_s3] sm:$0xff]  ;;  %v146_v35 = vld [vmem:[%s5327_s3 + $0x58] sm:$0xff] }
  0x21   :  { %300 = vmatpush.msra.mxu2 %v152_v8  ;;  %216 = vmatpush.msrb.mxu0 %v137_v23  ;;  %v140_v28 = vld [vmem:[%s5327_s3 + $0x28] sm:$0xff]  ;;  %v139_v32 = vld [vmem:[%s5327_s3 + $0x20] sm:$0xff]  ;;  %v150_v36 = vld [vmem:[%s5327_s3 + $0x78] sm:$0xff] }
  0x22   :  { %320 = vmatpush.msra.mxu3 %v156_v9  ;;  %236 = vmatpush.msrb.mxu1 %v141_v24  ;;  %v145_v37 = vld [vmem:[%s5327_s3 + $0x50] sm:$0xff]  ;;  %v144_v39 = vld [vmem:[%s5327_s3 + $0x48] sm:$0xff]  ;;  %v143_v41 = vld [vmem:[%s5327_s3 + $0x40] sm:$0xff] }
  0x23   :  { %301 = vmatpush.msra.mxu2 %v151_v17  ;;  %217 = vmatpush.msrb.mxu0 %v136_v27  ;;  %v149_v38 = vld [vmem:[%s5327_s3 + $0x70] sm:$0xff]  ;;  %v148_v40 = vld [vmem:[%s5327_s3 + $0x68] sm:$0xff]  ;;  %v147_v42 = vld [vmem:[%s5327_s3 + $0x60] sm:$0xff] }
  0x24   :  { %321 = vmatpush.msra.mxu3 %v155_v18  ;;  %237 = vmatpush.msrb.mxu1 %v140_v28  ;;  %v386_v51 = vld [vmem:[%s5303_s5 + $0xa0] sm:$0xff]  ;;  %v162_v53 = vld [vmem:[%s5327_s3 + $0xd8] sm:$0xff]  ;;  %v161_v57 = vld [vmem:[%s5327_s3 + $0xd0] sm:$0xff] }
  0x25   :  { %442 = vmatpush.msrb.mxu2 %v369_v21  ;;  %218 = vmatpush.msrb.mxu0 %v135_v31  ;;  %v166_v54 = vld [vmem:[%s5327_s3 + $0xf8] sm:$0xff]  ;;  %v165_v58 = vld [vmem:[%s5327_s3 + $0xf0] sm:$0xff]  ;;  %v160_v61 = vld [vmem:[%s5327_s3 + $0xc8] sm:$0xff] }
  0x26   :  { %462 = vmatpush.msrb.mxu3 %v373_v22  ;;  %238 = vmatpush.msrb.mxu1 %v139_v32  ;;  %v596_v60 = vld [vmem:[%s5305_s7 + $0x30] sm:$0xff]  ;;  %v164_v62 = vld [vmem:[%s5327_s3 + $0xe8] sm:$0xff]  ;;  %v159_v1 = vld [vmem:[%s5327_s3 + $0xc0] sm:$0xff] }
  0x27   :  { %443 = vmatpush.msrb.mxu2 %v368_v25  ;;  %v591_v63 = vld [vmem:[%s5305_s7 + $0x8] sm:$0xff]  ;;  %v163_v2 = vld [vmem:[%s5327_s3 + $0xe0] sm:$0xff]  ;;  %v377_v5 = vld [vmem:[%s5303_s5 + $0x58] sm:$0xff] }
  0x28   :  { %463 = vmatpush.msrb.mxu3 %v372_v26  ;;  %v595_v0 = vld [vmem:[%s5305_s7 + $0x28] sm:$0xff]  ;;  %v590_v3 = vld [vmem:[%s5305_s7] sm:$0xff]  ;;  %v381_v6 = vld [vmem:[%s5303_s5 + $0x78] sm:$0xff] }
  0x29   :  { %444 = vmatpush.msrb.mxu2 %v367_v29  ;;  %v594_v4 = vld [vmem:[%s5305_s7 + $0x20] sm:$0xff]  ;;  %v609_v7 = vld [vmem:[%s5305_s7 + $0x98] sm:$0xff]  ;;  %v376_v9 = vld [vmem:[%s5303_s5 + $0x50] sm:$0xff] }
  0x2a   :  { %464 = vmatpush.msrb.mxu3 %v371_v30  ;;  %v613_v8 = vld [vmem:[%s5305_s7 + $0xb8] sm:$0xff]  ;;  %v380_v10 = vld [vmem:[%s5303_s5 + $0x70] sm:$0xff]  ;;  %v374_v17 = vld [vmem:[%s5303_s5 + $0x40] sm:$0xff] }
  0x2b   :  { %445 = vmatpush.msrb.mxu2 %v366_v33  ;;  %v378_v18 = vld [vmem:[%s5303_s5 + $0x60] sm:$0xff]  ;;  %v393_v21 = vld [vmem:[%s5303_s5 + $0xd8] sm:$0xff]  ;;  %v392_v23 = vld [vmem:[%s5303_s5 + $0xd0] sm:$0xff] }
  0x2c   :  { %465 = vmatpush.msrb.mxu3 %v370_v34  ;;  %v606_v19 = vld [vmem:[%s5305_s7 + $0x80] sm:$0xff]  ;;  %v397_v22 = vld [vmem:[%s5303_s5 + $0xf8] sm:$0xff]  ;;  %v396_v24 = vld [vmem:[%s5303_s5 + $0xf0] sm:$0xff] }
  0x2d   :  { %v610_v20 = vld [vmem:[%s5305_s7 + $0xa0] sm:$0xff]  ;;  %v391_v25 = vld [vmem:[%s5303_s5 + $0xc8] sm:$0xff]  ;;  %v601_v29 = vld [vmem:[%s5305_s7 + $0x58] sm:$0xff] }
  0x2e   :  { %v395_v26 = vld [vmem:[%s5303_s5 + $0xe8] sm:$0xff]  ;;  %v390_v27 = vld [vmem:[%s5303_s5 + $0xc0] sm:$0xff]  ;;  %v605_v30 = vld [vmem:[%s5305_s7 + $0x78] sm:$0xff] }
  0x2f   :  { %v394_v28 = vld [vmem:[%s5303_s5 + $0xe0] sm:$0xff]  ;;  %v600_v31 = vld [vmem:[%s5305_s7 + $0x50] sm:$0xff]  ;;  %v599_v33 = vld [vmem:[%s5305_s7 + $0x48] sm:$0xff] }
  0x30   :  { %v604_v32 = vld [vmem:[%s5305_s7 + $0x70] sm:$0xff]  ;;  %v603_v34 = vld [vmem:[%s5305_s7 + $0x68] sm:$0xff] }
  0x7e   :  { %v72_v12 = vpop.permute.xlu0 %71 }
  0x7f   :  { %vm74_vm1 = vcmp.eq.s32.totalorder %v72_v12, %v64_v11  ;;  %v612_v12 = vld [vmem:[%s5305_s7 + $0xb0] sm:$0xff] }
  0x80   :  { %v3415_v14 = vsel %vm74_vm1, 1.0, %v3884_v13 }
  0x81   :  { %3417 = vmatmul.msk.f32.vlgmr.msra.gmra.mxu1 %vm80_vm0, %v3415_v14  ;;  %v379_v14 = vld [vmem:[%s5303_s5 + $0x68] sm:$0xff] }
  0x82   :  { %275 = vmatpush.msra.mxu1 %v150_v36  ;;  %v602_v36 = vld [vmem:[%s5305_s7 + $0x60] sm:$0xff] }
  0x84   :  { %276 = vmatpush.msra.mxu1 %v149_v38  ;;  %v621_v38 = vld [vmem:[%s5305_s7 + $0xf8] sm:$0xff] }
  0x86   :  { %v69_v15 = vpop.permute.xlu0 %68  ;;  %277 = vmatpush.msra.mxu1 %v148_v40  ;;  %v620_v40 = vld [vmem:[%s5305_s7 + $0xf0] sm:$0xff] }
  0x87   :  { %vm73_vm2 = vcmp.eq.s32.totalorder %v69_v15, %v64_v11  ;;  %v608_v11 = vld [vmem:[%s5305_s7 + $0x90] sm:$0xff]  ;;  %v607_v15 = vld [vmem:[%s5305_s7 + $0x88] sm:$0xff] }
  0x88   :  { %v3414_v16 = vsel %vm73_vm2, 1.0, %v3884_v13  ;;  %278 = vmatpush.msra.mxu1 %v147_v42  ;;  %v375_v13 = vld [vmem:[%s5303_s5 + $0x48] sm:$0xff] }
  0x89   :  { %3416 = vmatmul.msk.f32.vlgmr.msra.gmra.mxu0 %vm80_vm0, %v3414_v16  ;;  %v611_v16 = vld [vmem:[%s5305_s7 + $0xa8] sm:$0xff] }
  0x8a   :  { %255 = vmatpush.msra.mxu0 %v146_v35  ;;  %v598_v35 = vld [vmem:[%s5305_s7 + $0x40] sm:$0xff]  ;;  %v619_v42 = vld [vmem:[%s5305_s7 + $0xe8] sm:$0xff] }
  0x8c   :  { %256 = vmatpush.msra.mxu0 %v145_v37  ;;  %v617_v37 = vld [vmem:[%s5305_s7 + $0xd8] sm:$0xff] }
  0x8e   :  { %257 = vmatpush.msra.mxu0 %v144_v39  ;;  %v616_v39 = vld [vmem:[%s5305_s7 + $0xd0] sm:$0xff] }
  0x90   :  { %258 = vmatpush.msra.mxu0 %v143_v41  ;;  %v615_v41 = vld [vmem:[%s5305_s7 + $0xc8] sm:$0xff] }
  0xfe   :  { %v4103_v45 = vpop.f32.mrf.mxu1 }
  0xff   :  { %3422 = vmatmul.msk.f32.vlgmr.msra.gmra.mxu2 %vm199_vm3, %v4103_v45  ;;  %3423 = vmatmul.msk.f32.vlgmr.msra.gmra.mxu3 %vm199_vm3, %v4103_v45 }
 0x100   :  { %522 = vmatpush.msra.mxu2 %v385_v43  ;;  %542 = vmatpush.msra.mxu3 %v389_v44  ;;  %v614_v43 = vld [vmem:[%s5305_s7 + $0xc0] sm:$0xff] }
 0x101   :  { %v618_v44 = vld [vmem:[%s5305_s7 + $0xe0] sm:$0xff] }
 0x102   :  { %523 = vmatpush.msra.mxu2 %v384_v46  ;;  %543 = vmatpush.msra.mxu3 %v388_v47 }
 0x104   :  { %524 = vmatpush.msra.mxu2 %v383_v48  ;;  %544 = vmatpush.msra.mxu3 %v387_v49 }
 0x106   :  { %v4127_v52 = vpop.f32.mrf.mxu0  ;;  %525 = vmatpush.msra.mxu2 %v382_v50  ;;  %545 = vmatpush.msra.mxu3 %v386_v51  ;;  %v3709_v50 = vld [vmem:[%s5304_s6] ss:$0 sm:$0xff]  ;;  %v3710_v51 = vld [vmem:[%s5304_s6 + $0x1] ss:$0 sm:$0xff] }
 0x107   :  { %3418 = vmatmul.msk.f32.vlgmr.msrb.gmra.mxu0 %vm199_vm3, %v4127_v52  ;;  %3419 = vmatmul.msk.f32.vlgmr.msrb.gmra.mxu1 %vm199_vm3, %v4127_v52 }
 0x108   :  { %3426 = vmatmul.msk.f32.vlgmr.msrb.gmra.mxu2 %vm199_vm3, %v4127_v52  ;;  %3427 = vmatmul.msk.f32.vlgmr.msrb.gmra.mxu3 %vm199_vm3, %v4127_v52 }
 0x109   :  { %338 = vmatpush.msrb.mxu0 %v162_v53  ;;  %358 = vmatpush.msrb.mxu1 %v166_v54  ;;  %v3707_v53 = vld [vmem:[%s5302_s4] ss:$0 sm:$0xff]  ;;  %v3708_v54 = vld [vmem:[%s5302_s4 + $0x1] ss:$0 sm:$0xff] }
 0x10a   :  { %666 = vmatpush.msrb.mxu2 %v593_v55  ;;  %686 = vmatpush.msrb.mxu3 %v597_v56 }
 0x10b   :  { %339 = vmatpush.msrb.mxu0 %v161_v57  ;;  %359 = vmatpush.msrb.mxu1 %v165_v58 }
 0x10c   :  { %667 = vmatpush.msrb.mxu2 %v592_v59  ;;  %687 = vmatpush.msrb.mxu3 %v596_v60 }
 0x10d   :  { %340 = vmatpush.msrb.mxu0 %v160_v61  ;;  %360 = vmatpush.msrb.mxu1 %v164_v62 }
 0x10e   :  { %668 = vmatpush.msrb.mxu2 %v591_v63  ;;  %688 = vmatpush.msrb.mxu3 %v595_v0  ;;  %v3713_v63 = vld [vmem:[%s5304_s6 + $0x4] ss:$0 sm:$0xff]  ;;  %v3714_v0 = vld [vmem:[%s5304_s6 + $0x5] ss:$0 sm:$0xff] }
 0x10f   :  { %3420 = vmatmul.msk.f32.vlgmr.msra.gmra.mxu0 %vm199_vm3, %v4127_v52  ;;  %3421 = vmatmul.msk.f32.vlgmr.msra.gmra.mxu1 %vm199_vm3, %v4127_v52 }
 0x110   :  { %3430 = vmatmul.msk.f32.vlgmr.msra.gmra.mxu2 %vm199_vm3, %v4103_v45  ;;  %3431 = vmatmul.msk.f32.vlgmr.msra.gmra.mxu3 %vm199_vm3, %v4103_v45 }
 0x111   :  { %341 = vmatpush.msrb.mxu0 %v159_v1  ;;  %361 = vmatpush.msrb.mxu1 %v163_v2  ;;  %v3705_v1 = vld [vmem:[%s5302_s4 + $0x4] ss:$0 sm:$0xff]  ;;  %v3706_v2 = vld [vmem:[%s5302_s4 + $0x5] ss:$0 sm:$0xff] }
 0x112   :  { %669 = vmatpush.msrb.mxu2 %v590_v3  ;;  %689 = vmatpush.msrb.mxu3 %v594_v4 }
 0x113   :  { %482 = vmatpush.msra.mxu0 %v377_v5  ;;  %502 = vmatpush.msra.mxu1 %v381_v6 }
 0x114   :  { %746 = vmatpush.msra.mxu2 %v609_v7  ;;  %766 = vmatpush.msra.mxu3 %v613_v8 }
 0x115   :  { %483 = vmatpush.msra.mxu0 %v376_v9  ;;  %503 = vmatpush.msra.mxu1 %v380_v10 }
 0x116   :  { %747 = vmatpush.msra.mxu2 %v608_v11  ;;  %767 = vmatpush.msra.mxu3 %v612_v12  ;;  %v3717_v11 = vld [vmem:[%s5306_s8] ss:$0 sm:$0xff]  ;;  %v3718_v12 = vld [vmem:[%s5306_s8 + $0x1] ss:$0 sm:$0xff] }
 0x117   :  { %3424 = vmatmul.msk.f32.vlgmr.msrb.gmra.mxu0 %vm199_vm3, %v4103_v45  ;;  %3425 = vmatmul.msk.f32.vlgmr.msrb.gmra.mxu1 %vm199_vm3, %v4103_v45 }
 0x118   :  { %3434 = vmatmul.msk.f32.vlgmr.msrb.gmra.mxu2 %vm199_vm3, %v4127_v52  ;;  %3435 = vmatmul.msk.f32.vlgmr.msrb.gmra.mxu3 %vm199_vm3, %v4127_v52 }
 0x119   :  { %484 = vmatpush.msra.mxu0 %v375_v13  ;;  %504 = vmatpush.msra.mxu1 %v379_v14  ;;  %v3719_v13 = vld [vmem:[%s5304_s6 + $0x2] ss:$0 sm:$0xff]  ;;  %v3720_v14 = vld [vmem:[%s5304_s6 + $0x3] ss:$0 sm:$0xff] }
 0x11a   :  { %748 = vmatpush.msra.mxu2 %v607_v15  ;;  %768 = vmatpush.msra.mxu3 %v611_v16 }
 0x11b   :  { %485 = vmatpush.msra.mxu0 %v374_v17  ;;  %505 = vmatpush.msra.mxu1 %v378_v18  ;;  %v3711_v17 = vld [vmem:[%s5302_s4 + $0x2] ss:$0 sm:$0xff]  ;;  %v3712_v18 = vld [vmem:[%s5302_s4 + $0x3] ss:$0 sm:$0xff] }
 0x11c   :  { %749 = vmatpush.msra.mxu2 %v606_v19  ;;  %769 = vmatpush.msra.mxu3 %v610_v20 }
 0x11d   :  { %562 = vmatpush.msrb.mxu0 %v393_v21  ;;  %582 = vmatpush.msrb.mxu1 %v397_v22 }
 0x11f   :  { %3428 = vmatmul.msk.f32.vlgmr.msra.gmra.mxu0 %vm199_vm3, %v4127_v52  ;;  %3429 = vmatmul.msk.f32.vlgmr.msra.gmra.mxu1 %vm199_vm3, %v4127_v52 }
 0x120   :  { %3438 = vmatmul.msk.f32.vlgmr.msra.gmra.mxu2 %vm199_vm3, %v4103_v45  ;;  %3439 = vmatmul.msk.f32.vlgmr.msra.gmra.mxu3 %vm199_vm3, %v4103_v45 }
 0x121   :  { %563 = vmatpush.msrb.mxu0 %v392_v23  ;;  %583 = vmatpush.msrb.mxu1 %v396_v24 }
 0x123   :  { %564 = vmatpush.msrb.mxu0 %v391_v25  ;;  %584 = vmatpush.msrb.mxu1 %v395_v26 }
 0x125   :  { %565 = vmatpush.msrb.mxu0 %v390_v27  ;;  %585 = vmatpush.msrb.mxu1 %v394_v28  ;;  %v3721_v27 = vld [vmem:[%s5306_s8 + $0x4] ss:$0 sm:$0xff]  ;;  %v3722_v28 = vld [vmem:[%s5306_s8 + $0x5] ss:$0 sm:$0xff] }
 0x127   :  { %706 = vmatpush.msra.mxu0 %v601_v29  ;;  %726 = vmatpush.msra.mxu1 %v605_v30  ;;  %v3723_v29 = vld [vmem:[%s5304_s6 + $0x6] ss:$0 sm:$0xff]  ;;  %v3724_v30 = vld [vmem:[%s5304_s6 + $0x7] ss:$0 sm:$0xff] }
 0x128   :  { %3432 = vmatmul.msk.f32.vlgmr.msrb.gmra.mxu0 %vm199_vm3, %v4103_v45  ;;  %3433 = vmatmul.msk.f32.vlgmr.msrb.gmra.mxu1 %vm199_vm3, %v4103_v45 }
 0x129   :  { %707 = vmatpush.msra.mxu0 %v600_v31  ;;  %727 = vmatpush.msra.mxu1 %v604_v32 }
 0x12b   :  { %708 = vmatpush.msra.mxu0 %v599_v33  ;;  %728 = vmatpush.msra.mxu1 %v603_v34  ;;  %v3715_v33 = vld [vmem:[%s5302_s4 + $0x6] ss:$0 sm:$0xff]  ;;  %v3716_v34 = vld [vmem:[%s5302_s4 + $0x7] ss:$0 sm:$0xff] }
 0x12d   :  { %709 = vmatpush.msra.mxu0 %v598_v35  ;;  %729 = vmatpush.msra.mxu1 %v602_v36 }
 0x12f   :  { %786 = vmatpush.msrb.mxu0 %v617_v37  ;;  %806 = vmatpush.msrb.mxu1 %v621_v38 }
 0x130   :  { %3436 = vmatmul.msk.f32.vlgmr.msra.gmra.mxu0 %vm199_vm3, %v4127_v52  ;;  %3437 = vmatmul.msk.f32.vlgmr.msra.gmra.mxu1 %vm199_vm3, %v4127_v52 }
 0x131   :  { %787 = vmatpush.msrb.mxu0 %v616_v39  ;;  %807 = vmatpush.msrb.mxu1 %v620_v40 }
 0x133   :  { %788 = vmatpush.msrb.mxu0 %v615_v41  ;;  %808 = vmatpush.msrb.mxu1 %v619_v42 }
 0x135   :  { %789 = vmatpush.msrb.mxu0 %v614_v43  ;;  %809 = vmatpush.msrb.mxu1 %v618_v44  ;;  %v3725_v43 = vld [vmem:[%s5306_s8 + $0x2] ss:$0 sm:$0xff]  ;;  %v3726_v44 = vld [vmem:[%s5306_s8 + $0x3] ss:$0 sm:$0xff] }
 0x138   :  { %3440 = vmatmul.msk.f32.vlgmr.msrb.gmra.mxu0 %vm199_vm3, %v4103_v45  ;;  %3441 = vmatmul.msk.f32.vlgmr.msrb.gmra.mxu1 %vm199_vm3, %v4103_v45 }
 0x182   :  { %v303_v46 = vpop.f32.mrf.mxu2  ;;  %v323_v47 = vpop.f32.mrf.mxu3 }
 0x183   :  { %v304_v9 = vadd.f32 %v3705_v1, %v303_v46  ;;  %v324_v10 = vadd.f32 %v3706_v2, %v323_v47 }
 0x184   :  { %v220_v48 = vpop.f32.mrf.mxu0  ;;  %v240_v49 = vpop.f32.mrf.mxu1 }
 0x185   :  { %v221_v61 = vadd.f32 %v3707_v53, %v220_v48  ;;  %v241_v62 = vadd.f32 %v3708_v54, %v240_v49 }
 0x18b   :  { %v447_v55 = vpop.f32.mrf.mxu2  ;;  %v467_v56 = vpop.f32.mrf.mxu3 }
 0x18c   :  { %v448_v57 = vadd.f32 %v3709_v50, %v447_v55  ;;  %v468_v58 = vadd.f32 %v3710_v51, %v467_v56  ;;  %v260_v59 = vpop.f32.mrf.mxu0  ;;  %v280_v60 = vpop.f32.mrf.mxu1  ;;  %v3727_v50 = vld [vmem:[%s5306_s8 + $0x6] ss:$0 sm:$0xff]  ;;  %v3728_v51 = vld [vmem:[%s5306_s8 + $0x7] ss:$0 sm:$0xff] }
 0x18d   :  { %v261_v25 = vadd.f32 %v3711_v17, %v260_v59  ;;  %v281_v26 = vadd.f32 %v3712_v18, %v280_v60 }
 0x18e   :  { %3442 = vmatpush.xpose.msk.msrb.mxu2 %vm80_vm0, %v448_v57  ;;  %3444 = vmatpush.xpose.msk.msrb.mxu3 %vm80_vm0, %v468_v58  ;;  %v127_v57 = vld [vmem:[%s5328_s28] sm:$0xff] }
 0x191   :  { %3443 = vmatmul.msk.f32.vlgmr.msrb.gmra.mxu2 %vm80_vm0, %v221_v61  ;;  %3445 = vmatmul.msk.f32.vlgmr.msrb.gmra.mxu3 %vm80_vm0, %v241_v62  ;;  %v128_v62 = vld [vmem:[%s5328_s28 + $0x8] sm:$0xff] }
 0x193   :  { %v527_v3 = vpop.f32.mrf.mxu2  ;;  %v547_v4 = vpop.f32.mrf.mxu3 }
 0x194   :  { %v528_v5 = vadd.f32 %v3713_v63, %v527_v3  ;;  %v548_v6 = vadd.f32 %v3714_v0, %v547_v4  ;;  %v343_v7 = vpop.f32.mrf.mxu0  ;;  %v363_v8 = vpop.f32.mrf.mxu1  ;;  %v131_v63 = vld [vmem:[%s5328_s28 + $0x20] sm:$0xff]  ;;  %v129_v3 = vld [vmem:[%s5328_s28 + $0x10] sm:$0xff] }
 0x195   :  { %v344_v41 = vadd.f32 %v3715_v33, %v343_v7  ;;  %v364_v42 = vadd.f32 %v3716_v34, %v363_v8  ;;  %v132_v8 = vld [vmem:[%s5328_s28 + $0x28] sm:$0xff] }
 0x196   :  { %3450 = vmatpush.xpose.msk.msra.mxu2 %vm80_vm0, %v528_v5  ;;  %3452 = vmatpush.xpose.msk.msra.mxu3 %vm80_vm0, %v548_v6 }
 0x199   :  { %3451 = vmatmul.msk.f32.vlgmr.msra.gmra.mxu2 %vm80_vm0, %v304_v9  ;;  %3453 = vmatmul.msk.f32.vlgmr.msra.gmra.mxu3 %vm80_vm0, %v324_v10 }
 0x19b   :  { %v671_v15 = vpop.f32.mrf.mxu2  ;;  %v691_v16 = vpop.f32.mrf.mxu3 }
 0x19c   :  { %v672_v19 = vadd.f32 %v3717_v11, %v671_v15  ;;  %v692_v20 = vadd.f32 %v3718_v12, %v691_v16  ;;  %v487_v21 = vpop.f32.mrf.mxu0  ;;  %v507_v22 = vpop.f32.mrf.mxu1  ;;  %v134_v16 = vld [vmem:[%s5328_s28 + $0x38] sm:$0xff] }
 0x19d   :  { %v488_v23 = vadd.f32 %v3719_v13, %v487_v21  ;;  %v508_v24 = vadd.f32 %v3720_v14, %v507_v22  ;;  %v130_v13 = vld [vmem:[%s5328_s28 + $0x18] sm:$0xff] }
 0x19e   :  { %1128 = vmatpush.msrb.mxu2 %v672_v19  ;;  %1151 = vmatpush.msrb.mxu3 %v692_v20  ;;  %v133_v19 = vld [vmem:[%s5328_s28 + $0x30] sm:$0xff] }
 0x19f   :  { %3446 = vmatpush.xpose.msk.msra.mxu0 %vm80_vm0, %v488_v23  ;;  %3448 = vmatpush.xpose.msk.msra.mxu1 %vm80_vm0, %v508_v24 }
 0x1a2   :  { %3447 = vmatmul.msk.f32.vlgmr.msra.gmra.mxu0 %vm80_vm0, %v261_v25  ;;  %3449 = vmatmul.msk.f32.vlgmr.msra.gmra.mxu1 %vm80_vm0, %v281_v26 }
 0x1a3   :  { %v751_v31 = vpop.f32.mrf.mxu2  ;;  %v771_v32 = vpop.f32.mrf.mxu3 }
 0x1a4   :  { %v752_v35 = vadd.f32 %v3721_v27, %v751_v31  ;;  %v772_v36 = vadd.f32 %v3722_v28, %v771_v32 }
 0x1a5   :  { %v567_v37 = vpop.f32.mrf.mxu0  ;;  %v587_v38 = vpop.f32.mrf.mxu1 }
 0x1a6   :  { %v568_v39 = vadd.f32 %v3723_v29, %v567_v37  ;;  %v588_v40 = vadd.f32 %v3724_v30, %v587_v38  ;;  %1220 = vmatpush.msra.mxu2 %v752_v35  ;;  %1243 = vmatpush.msra.mxu3 %v772_v36 }
 0x1a8   :  { %3454 = vmatpush.xpose.msk.msrb.mxu0 %vm80_vm0, %v568_v39  ;;  %3456 = vmatpush.xpose.msk.msrb.mxu1 %vm80_vm0, %v588_v40 }
 0x1ab   :  { %3455 = vmatmul.msk.f32.vlgmr.msrb.gmra.mxu0 %vm80_vm0, %v344_v41  ;;  %3457 = vmatmul.msk.f32.vlgmr.msrb.gmra.mxu1 %vm80_vm0, %v364_v42 }
 0x1ad   :  { %v711_v46 = vpop.f32.mrf.mxu0  ;;  %v731_v47 = vpop.f32.mrf.mxu1 }
 0x1ae   :  { %v712_v48 = vadd.f32 %v3725_v43, %v711_v46  ;;  %v732_v49 = vadd.f32 %v3726_v44, %v731_v47 }
 0x1b0   :  { %1174 = vmatpush.msra.mxu0 %v712_v48  ;;  %1197 = vmatpush.msra.mxu1 %v732_v49 }
 0x1b5   :  { %v791_v53 = vpop.f32.mrf.mxu0  ;;  %v811_v54 = vpop.f32.mrf.mxu1 }
 0x1b6   :  { %v792_v55 = vadd.f32 %v3727_v50, %v791_v53  ;;  %v812_v56 = vadd.f32 %v3728_v51, %v811_v54 }
 0x1b8   :  { %1266 = vmatpush.msrb.mxu0 %v792_v55  ;;  %1289 = vmatpush.msrb.mxu1 %v812_v56 }
 0x214   :  { %v837_v58 = vpop.f32.mrf.mxu2  ;;  %v863_v60 = vpop.f32.mrf.mxu3 }
 0x215   :  { %v838_v59 = vadd.f32 %v837_v58, %v127_v57  ;;  %v864_v0 = vadd.f32 %v863_v60, %v128_v62 }
 0x217   :  { %v1022_v61 = vsel %vm80_vm0, %v838_v59, -inf  ;;  %v1025_v7 = vsel %vm80_vm0, %v864_v0, -inf }
 0x218   :  { %1023 = vmax.xlane.f32.xlu1 %v1022_v61 }
 0x21c   :  { %v941_v1 = vpop.f32.mrf.mxu2  ;;  %v967_v9 = vpop.f32.mrf.mxu3 }
 0x21d   :  { %v942_v2 = vadd.f32 %v941_v1, %v131_v63  ;;  %v968_v12 = vadd.f32 %v967_v9, %v132_v8 }
 0x21f   :  { %v889_v4 = vpop.f32.mrf.mxu0  ;;  %v915_v5 = vpop.f32.mrf.mxu1  ;;  %v1034_v6 = vsel %vm80_vm0, %v942_v2, -inf  ;;  %v1037_v15 = vsel %vm80_vm0, %v968_v12, -inf }
 0x220   :  { %v890_v10 = vadd.f32 %v889_v4, %v129_v3  ;;  %1035 = vmax.xlane.f32.xlu0 %v1034_v6  ;;  %1026 = vmax.xlane.f32.xlu1 %v1025_v7  ;;  %v916_v14 = vadd.f32 %v915_v5, %v130_v13 }
 0x222   :  { %v1028_v11 = vsel %vm80_vm0, %v890_v10, -inf  ;;  %v1031_v18 = vsel %vm80_vm0, %v916_v14, -inf }
 0x223   :  { %1029 = vmax.xlane.f32.xlu2 %v1028_v11 }
 0x228   :  { %v1019_v17 = vpop.f32.mrf.mxu1  ;;  %1038 = vmax.xlane.f32.xlu1 %v1037_v15  ;;  %v993_v20 = vpop.f32.mrf.mxu0 }
 0x229   :  { %v1020_v21 = vadd.f32 %v1019_v17, %v134_v16  ;;  %v994_v22 = vadd.f32 %v993_v20, %v133_v19 }
 0x22b   :  { %1032 = vmax.xlane.f32.xlu2 %v1031_v18  ;;  %v1043_v23 = vsel %vm80_vm0, %v1020_v21, -inf  ;;  %v1040_v24 = vsel %vm80_vm0, %v994_v22, -inf }
 0x230   :  { %1044 = vmax.xlane.f32.xlu1 %v1043_v23 }
 0x233   :  { %1041 = vmax.xlane.f32.xlu2 %v1040_v24 }
 0x28b   :  { %v1024_v25 = vpop.xlane.xlu1 %1023 }
 0x28c   :  { %v1046_v26 = vsub.f32 %v838_v59, %v1024_v25 }
 0x28e   :  { %v1054_v27 = vmul.f32 1.442695, %v1046_v26 }
 0x290   :  { %3767 = vpow2.f32 %v1054_v27  ;;  %v1294_v27 = vld [vmem:[%s5307_s9] sm:$0xff] }
 0x293   :  { %v1027_v28 = vpop.xlane.xlu1 %1026  ;;  %v1036_v31 = vpop.xlane.xlu0 %1035 }
 0x294   :  { %v1047_v29 = vsub.f32 %v864_v0, %v1027_v28  ;;  %v1050_v36 = vsub.f32 %v942_v2, %v1036_v31  ;;  %v1296_v28 = vld [vmem:[%s5307_s9 + $0x10] sm:$0xff]  ;;  %v1298_v31 = vld [vmem:[%s5307_s9 + $0x20] sm:$0xff] }
 0x296   :  { %v3768_v30 = vpop.eup %3767  ;;  %v1056_v32 = vmul.f32 1.442695, %v1047_v29  ;;  %v1030_v33 = vpop.xlane.xlu2 %1029  ;;  %v1062_v39 = vmul.f32 1.442695, %v1050_v36  ;;  %v1295_v29 = vld [vmem:[%s5307_s9 + $0x8] sm:$0xff] }
 0x297   :  { %v1048_v34 = vsub.f32 %v890_v10, %v1030_v33  ;;  %v1070_v35 = vsel %vm80_vm0, %v3768_v30, 0.0  ;;  %v1299_v33 = vld [vmem:[%s5307_s9 + $0x28] sm:$0xff] }
 0x298   :  { %1071 = vadd.xlane.f32.xlu2 %v1070_v35  ;;  %3769 = vpow2.f32 %v1056_v32  ;;  %v1300_v32 = vld [vmem:[%s5307_s9 + $0x30] sm:$0xff] }
 0x299   :  { %v1058_v37 = vmul.f32 1.442695, %v1048_v34  ;;  %v1301_v34 = vld [vmem:[%s5307_s9 + $0x38] sm:$0xff] }
 0x29b   :  { %3771 = vpow2.f32 %v1058_v37  ;;  %v1039_v38 = vpop.xlane.xlu1 %1038 }
 0x29c   :  { %3773 = vpow2.f32 %v1062_v39  ;;  %v1051_v46 = vsub.f32 %v968_v12, %v1039_v38 }
 0x29e   :  { %v1033_v40 = vpop.xlane.xlu2 %1032  ;;  %v3770_v41 = vpop.eup %3769  ;;  %v1064_v49 = vmul.f32 1.442695, %v1051_v46 }
 0x29f   :  { %v1049_v42 = vsub.f32 %v916_v14, %v1033_v40  ;;  %v1073_v43 = vsel %vm80_vm0, %v3770_v41, 0.0 }
 0x2a0   :  { %1074 = vadd.xlane.f32.xlu1 %v1073_v43 }
 0x2a1   :  { %v3772_v44 = vpop.eup %3771  ;;  %v1060_v47 = vmul.f32 1.442695, %v1049_v42 }
 0x2a2   :  { %v1076_v48 = vsel %vm80_vm0, %v3772_v44, 0.0  ;;  %v3774_v53 = vpop.eup %3773 }
 0x2a3   :  { %3775 = vpow2.f32 %v1060_v47  ;;  %1077 = vadd.xlane.f32.xlu2 %v1076_v48  ;;  %v1045_v50 = vpop.xlane.xlu1 %1044  ;;  %v1082_v58 = vsel %vm80_vm0, %v3774_v53, 0.0 }
 0x2a4   :  { %3777 = vpow2.f32 %v1064_v49  ;;  %v1053_v56 = vsub.f32 %v1020_v21, %v1045_v50 }
 0x2a6   :  { %v1042_v51 = vpop.xlane.xlu2 %1041  ;;  %v1068_v60 = vmul.f32 1.442695, %v1053_v56 }
 0x2a7   :  { %v1052_v54 = vsub.f32 %v994_v22, %v1042_v51 }
 0x2a9   :  { %v3776_v55 = vpop.eup %3775  ;;  %v1066_v57 = vmul.f32 1.442695, %v1052_v54  ;;  %v3729_v54 = vld [vmem:[%s5308_s10] ss:$0 sm:$0xff] }
 0x2aa   :  { %v1079_v59 = vsel %vm80_vm0, %v3776_v55, 0.0  ;;  %v3778_v61 = vpop.eup %3777 }
 0x2ab   :  { %3779 = vpow2.f32 %v1066_v57  ;;  %1083 = vadd.xlane.f32.xlu2 %v1082_v58  ;;  %1080 = vadd.xlane.f32.xlu1 %v1079_v59  ;;  %v1085_v0 = vsel %vm80_vm0, %v3778_v61, 0.0 }
 0x2ac   :  { %3781 = vpow2.f32 %v1068_v60 }
 0x2b1   :  { %v3780_v62 = vpop.eup %3779 }
 0x2b2   :  { %v1088_v63 = vsel %vm80_vm0, %v3780_v62, 0.0  ;;  %v3782_v1 = vpop.eup %3781 }
 0x2b3   :  { %1089 = vadd.xlane.f32.xlu2 %v1088_v63  ;;  %1086 = vadd.xlane.f32.xlu1 %v1085_v0  ;;  %v1091_v2 = vsel %vm80_vm0, %v3782_v1, 0.0 }
 0x2bb   :  { %1092 = vadd.xlane.f32.xlu1 %v1091_v2 }
 0x30b   :  { %v1072_v3 = vpop.xlane.xlu2 %1071 }
 0x30c   :  { %3783 = vrcp.f32 %v1072_v3 }
 0x312   :  { %v3784_v4 = vpop.eup %3783 }
 0x313   :  { %v1102_v5 = vmul.f32 %v3784_v4, %v3768_v30  ;;  %v1075_v6 = vpop.xlane.xlu1 %1074  ;;  %v1297_v30 = vld [vmem:[%s5307_s9 + $0x18] sm:$0xff] }
 0x314   :  { %3785 = vrcp.f32 %v1075_v6 }
 0x315   :  { %3458 = vmatmul.msk.f32.vlgmr.msrb.gmra.mxu2 %vm80_vm0, %v1102_v5 }
 0x316   :  { %v1078_v7 = vpop.xlane.xlu2 %1077  ;;  %1320 = vmatpush.msrb.mxu2 %v1294_v27  ;;  %v1572_v27 = vld [vmem:[%s5311_s13 + $0x8] sm:$0xff] }
 0x317   :  { %3787 = vrcp.f32 %v1078_v7 }
 0x31a   :  { %v3786_v8 = vpop.eup %3785 }
 0x31b   :  { %v1103_v9 = vmul.f32 %v3786_v8, %v3770_v41 }
 0x31d   :  { %v3788_v10 = vpop.eup %3787  ;;  %3459 = vmatmul.msk.f32.vlgmr.msrb.gmra.mxu3 %vm80_vm0, %v1103_v9  ;;  %v3885_v9 = vmov 32.0  }
 0x31e   :  { %v1104_v11 = vmul.f32 %v3788_v10, %v3772_v44  ;;  %v1084_v12 = vpop.xlane.xlu2 %1083  ;;  %v1081_v13 = vpop.xlane.xlu1 %1080  ;;  %1343 = vmatpush.msrb.mxu3 %v1295_v29 }
 0x31f   :  { %3789 = vrcp.f32 %v1084_v12 }
 0x320   :  { %3791 = vrcp.f32 %v1081_v13  ;;  %3460 = vmatmul.msk.f32.vlgmr.msra.gmra.mxu0 %vm80_vm0, %v1104_v11 }
 0x321   :  { %1366 = vmatpush.msra.mxu0 %v1296_v28  ;;  %v1571_v28 = vld [vmem:[%s5311_s13] sm:$0xff] }
 0x325   :  { %v3790_v14 = vpop.eup %3789 }
 0x326   :  { %v3792_v15 = vpop.eup %3791  ;;  %v1106_v16 = vmul.f32 %v3790_v14, %v3774_v53  ;;  %v1090_v17 = vpop.xlane.xlu2 %1089 }
 0x327   :  { %v1087_v18 = vpop.xlane.xlu1 %1086  ;;  %v1105_v19 = vmul.f32 %v3792_v15, %v3776_v55  ;;  %3793 = vrcp.f32 %v1090_v17 }
 0x328   :  { %3795 = vrcp.f32 %v1087_v18  ;;  %3462 = vmatmul.msk.f32.vlgmr.msra.gmra.mxu2 %vm80_vm0, %v1106_v16 }
 0x329   :  { %3461 = vmatmul.msk.f32.vlgmr.msra.gmra.mxu1 %vm80_vm0, %v1105_v19  ;;  %1412 = vmatpush.msra.mxu2 %v1298_v31 }
 0x32a   :  { %1389 = vmatpush.msra.mxu1 %v1297_v30 }
 0x32d   :  { %v3794_v20 = vpop.eup %3793 }
 0x32e   :  { %v3796_v21 = vpop.eup %3795  ;;  %v1108_v22 = vmul.f32 %v3794_v20, %v3780_v62 }
 0x32f   :  { %v1093_v23 = vpop.xlane.xlu1 %1092  ;;  %v1107_v24 = vmul.f32 %v3796_v21, %v3778_v61 }
 0x330   :  { %3797 = vrcp.f32 %v1093_v23  ;;  %3464 = vmatmul.msk.f32.vlgmr.msrb.gmra.mxu0 %vm80_vm0, %v1108_v22 }
 0x331   :  { %3463 = vmatmul.msk.f32.vlgmr.msra.gmra.mxu3 %vm80_vm0, %v1107_v24  ;;  %1458 = vmatpush.msrb.mxu0 %v1300_v32  ;;  %3799 = vrcp.f32 %v3885_v9  ;;  %v1578_v32 = vld [vmem:[%s5311_s13 + $0x38] sm:$0xff]  ;;  %v1643_v9 = vld [vmem:[%s5313_s15 + $0x60] sm:$0xff] }
 0x332   :  { %1435 = vmatpush.msra.mxu3 %v1299_v33 }
 0x336   :  { %v3798_v25 = vpop.eup %3797 }
 0x337   :  { %v1109_v26 = vmul.f32 %v3798_v25, %v3782_v1  ;;  %v3800_v10 = vpop.eup %3799  ;;  %v1574_v25 = vld [vmem:[%s5311_s13 + $0x18] sm:$0xff] }
 0x338   :  { %v1517_v11 = vmul.f32 32.0, %v3800_v10  ;;  %vm1521_vm4 = vweird.f32 %v3800_v10 }
 0x339   :  { %3465 = vmatmul.msk.f32.vlgmr.msrb.gmra.mxu1 %vm80_vm0, %v1109_v26  ;;  %v1573_v26 = vld [vmem:[%s5311_s13 + $0x10] sm:$0xff] }
 0x33a   :  { %1481 = vmatpush.msrb.mxu1 %v1301_v34  ;;  %v1518_v12 = vsub.f32 1.0, %v1517_v11  ;;  %v1577_v34 = vld [vmem:[%s5311_s13 + $0x30] sm:$0xff] }
 0x33b   :  { %v1641_v11 = vld [vmem:[%s5313_s15 + $0x50] sm:$0xff] }
 0x33c   :  { %v1519_v13 = vmul.f32 %v3800_v10, %v1518_v12  ;;  %v1640_v12 = vld [vmem:[%s5313_s15 + $0x48] sm:$0xff] }
 0x33e   :  { %v1520_v14 = vadd.f32 %v3800_v10, %v1519_v13  ;;  %v1639_v13 = vld [vmem:[%s5313_s15 + $0x40] sm:$0xff] }
 0x340   :  { %v4524_v15 = vsel %vm1521_vm4, %v3800_v10, %v1520_v14  ;;  %v1642_v10 = vld [vmem:[%s5313_s15 + $0x58] sm:$0xff]  ;;  %v3732_v14 = vld [vmem:[%s5312_s14] ss:$0 sm:$0xff] }
 0x398   :  { %v1130_v35 = vpop.f32.mrf.mxu2 }
 0x399   :  { %3466 = vmatmul.msk.f32.vlgmr.msrb.gmra.mxu2 %vm80_vm0, %v1130_v35 }
 0x39a   :  { %1598 = vmatpush.msrb.mxu2 %v1574_v25 }
 0x39c   :  { %1599 = vmatpush.msrb.mxu2 %v1573_v26 }
 0x39d   :  { %v1176_v36 = vpop.f32.mrf.mxu0 }
 0x39e   :  { %3468 = vmatmul.msk.f32.vlgmr.msra.gmra.mxu0 %vm80_vm0, %v1176_v36  ;;  %1600 = vmatpush.msrb.mxu2 %v1572_v27  ;;  %v1576_v36 = vld [vmem:[%s5311_s13 + $0x28] sm:$0xff] }
 0x3a0   :  { %v1153_v37 = vpop.f32.mrf.mxu3  ;;  %1601 = vmatpush.msrb.mxu2 %v1571_v28 }
 0x3a1   :  { %3467 = vmatmul.msk.f32.vlgmr.msrb.gmra.mxu3 %vm80_vm0, %v1153_v37  ;;  %v1575_v37 = vld [vmem:[%s5311_s13 + $0x20] sm:$0xff] }
 0x3a2   :  { %1621 = vmatpush.msrb.mxu3 %v1578_v32 }
 0x3a4   :  { %1622 = vmatpush.msrb.mxu3 %v1577_v34 }
 0x3a6   :  { %v1199_v38 = vpop.f32.mrf.mxu1  ;;  %1623 = vmatpush.msrb.mxu3 %v1576_v36 }
 0x3a7   :  { %3469 = vmatmul.msk.f32.vlgmr.msra.gmra.mxu1 %vm80_vm0, %v1199_v38 }
 0x3a8   :  { %1624 = vmatpush.msrb.mxu3 %v1575_v37 }
 0x3ab   :  { %v1222_v39 = vpop.f32.mrf.mxu2 }
 0x3ac   :  { %3470 = vmatmul.msk.f32.vlgmr.msra.gmra.mxu2 %vm80_vm0, %v1222_v39 }
 0x3ad   :  { %v1268_v40 = vpop.f32.mrf.mxu0 }
 0x3ae   :  { %3472 = vmatmul.msk.f32.vlgmr.msrb.gmra.mxu0 %vm80_vm0, %v1268_v40  ;;  %v1638_v40 = vld [vmem:[%s5313_s15 + $0x38] sm:$0xff] }
 0x3af   :  { %1663 = vmatpush.msra.mxu0 %v1638_v40  ;;  %v3481_v40 = vld [vmem:[%s5327_s3 + $0x118] sm:$0xff] }
 0x3b0   :  { %1837 = vmatpush.msra.mxu2 %v3481_v40  ;;  %v3537_v40 = vld [vmem:[%s5303_s5 + $0x158] sm:$0xff] }
 0x3b4   :  { %v1245_v41 = vpop.f32.mrf.mxu3 }
 0x3b5   :  { %3471 = vmatmul.msk.f32.vlgmr.msra.gmra.mxu3 %vm80_vm0, %v1245_v41  ;;  %v1637_v41 = vld [vmem:[%s5313_s15 + $0x30] sm:$0xff] }
 0x3b6   :  { %v1291_v42 = vpop.f32.mrf.mxu1  ;;  %1664 = vmatpush.msra.mxu0 %v1637_v41  ;;  %v3485_v41 = vld [vmem:[%s5327_s3 + $0x138] sm:$0xff] }
 0x3b7   :  { %3473 = vmatmul.msk.f32.vlgmr.msrb.gmra.mxu1 %vm80_vm0, %v1291_v42  ;;  %1857 = vmatpush.msra.mxu3 %v3485_v41  ;;  %v3541_v41 = vld [vmem:[%s5303_s5 + $0x178] sm:$0xff] }
 0x41b   :  { %v1368_v44 = vpop.f32.mrf.mxu0 }
 0x41c   :  { %v1322_v43 = vpop.f32.mrf.mxu2  ;;  %v1489_v51 = vsel %vm199_vm3, %v1368_v44, 0.0 }
 0x41d   :  { %v1486_v47 = vsel %vm199_vm3, %v1322_v43, 0.0  ;;  %v1636_v43 = vld [vmem:[%s5313_s15 + $0x28] sm:$0xff] }
 0x41e   :  { %1665 = vmatpush.msra.mxu0 %v1636_v43  ;;  %v3484_v43 = vld [vmem:[%s5327_s3 + $0x130] sm:$0xff] }
 0x41f   :  { %1858 = vmatpush.msra.mxu3 %v3484_v43  ;;  %v3536_v43 = vld [vmem:[%s5303_s5 + $0x150] sm:$0xff] }
 0x424   :  { %v1345_v46 = vpop.f32.mrf.mxu3  ;;  %v1391_v50 = vpop.f32.mrf.mxu1 }
 0x425   :  { %v1487_v48 = vsel %vm199_vm3, %v1345_v46, 0.0  ;;  %v1491_v55 = vsel %vm199_vm3, %v1391_v50, 0.0 }
 0x426   :  { %v1488_v49 = vadd.f32 %v1487_v48, %v1486_v47  ;;  %v1635_v48 = vld [vmem:[%s5313_s15 + $0x20] sm:$0xff] }
 0x427   :  { %1666 = vmatpush.msra.mxu0 %v1635_v48  ;;  %v3482_v48 = vld [vmem:[%s5327_s3 + $0x120] sm:$0xff] }
 0x428   :  { %v1490_v53 = vadd.f32 %v1489_v51, %v1488_v49  ;;  %v3730_v49 = vld [vmem:[%s5309_s11] ss:$0 sm:$0xff] }
 0x42a   :  { %v1492_v56 = vadd.f32 %v1491_v55, %v1490_v53  ;;  %v1634_v53 = vld [vmem:[%s5313_s15 + $0x18] sm:$0xff]  ;;  %v3731_v55 = vld [vmem:[%s5310_s12] ss:$0 sm:$0xff] }
 0x42b   :  { %v1460_v61 = vpop.f32.mrf.mxu0  ;;  %1667 = vmatpush.msra.mxu0 %v1634_v53  ;;  %v3492_v53 = vld [vmem:[%s5327_s3 + $0x170] sm:$0xff] }
 0x42c   :  { %v1504_v57 = vadd.f32 %v3729_v54, %v1492_v56  ;;  %v1496_v3 = vsel %vm199_vm3, %v1460_v61, 0.0 }
 0x42e   :  { %v1506_v58 = vadd.f32 %v1504_v57, %v4127_v52 }
 0x42f   :  { %v1414_v60 = vpop.f32.mrf.mxu2 }
 0x430   :  { %v1510_v59 = vsel %vm199_vm3, %v1506_v58, 0.0  ;;  %v1493_v63 = vsel %vm199_vm3, %v1414_v60, 0.0 }
 0x431   :  { %1511 = vadd.xlane.f32.xlu2 %v1510_v59 }
 0x434   :  { %v1483_v1 = vpop.f32.mrf.mxu1 }
 0x435   :  { %v1498_v5 = vsel %vm199_vm3, %v1483_v1, 0.0 }
 0x438   :  { %v1437_v62 = vpop.f32.mrf.mxu3 }
 0x439   :  { %v1494_v0 = vsel %vm199_vm3, %v1437_v62, 0.0 }
 0x43a   :  { %v1495_v2 = vadd.f32 %v1494_v0, %v1493_v63 }
 0x43c   :  { %v1497_v4 = vadd.f32 %v1496_v3, %v1495_v2 }
 0x43e   :  { %v1499_v6 = vadd.f32 %v1498_v5, %v1497_v4  ;;  %v1633_v4 = vld [vmem:[%s5313_s15 + $0x10] sm:$0xff]  ;;  %v1632_v5 = vld [vmem:[%s5313_s15 + $0x8] sm:$0xff] }
 0x43f   :  { %1668 = vmatpush.msra.mxu0 %v1633_v4  ;;  %v3499_v4 = vld [vmem:[%s5327_s3 + $0x1a8] sm:$0xff] }
 0x440   :  { %v1505_v7 = vadd.f32 %v3729_v54, %v1499_v6  ;;  %v1631_v6 = vld [vmem:[%s5313_s15] sm:$0xff] }
 0x441   :  { %1669 = vmatpush.msra.mxu0 %v1632_v5 }
 0x442   :  { %v1507_v52 = vadd.f32 %v1505_v7, %v4103_v45  ;;  %v1646_v7 = vld [vmem:[%s5313_s15 + $0x78] sm:$0xff] }
 0x443   :  { %1670 = vmatpush.msra.mxu0 %v1631_v6  ;;  %1686 = vmatpush.msra.mxu1 %v1646_v7  ;;  %v3494_v6 = vld [vmem:[%s5327_s3 + $0x180] sm:$0xff] }
 0x444   :  { %v1513_v8 = vsel %vm199_vm3, %v1507_v52, 0.0  ;;  %v3498_v7 = vld [vmem:[%s5327_s3 + $0x1a0] sm:$0xff] }
 0x445   :  { %1514 = vadd.xlane.f32.xlu0 %v1513_v8  ;;  %v1644_v8 = vld [vmem:[%s5313_s15 + $0x68] sm:$0xff] }
 0x4a4   :  { %v1512_v16 = vpop.xlane.xlu2 %1511 }
 0x4a5   :  { %v1523_v17 = vmul.f32 %v4524_v15, %v1512_v16 }
 0x4a7   :  { %v1525_v18 = vsub.f32 %v1506_v58, %v1523_v17 }
 0x4a9   :  { %v1527_v19 = vmul.f32 %v1525_v18, %v1525_v18 }
 0x4ab   :  { %v1529_v45 = vsel %vm199_vm3, %v1527_v19, 0.0 }
 0x4ac   :  { %1530 = vadd.xlane.f32.xlu1 %v1529_v45 }
 0x4b8   :  { %v1515_v20 = vpop.xlane.xlu0 %1514 }
 0x4b9   :  { %v1524_v21 = vmul.f32 %v4524_v15, %v1515_v20 }
 0x4bb   :  { %v4529_v22 = vsub.f32 %v1507_v52, %v1524_v21  ;;  %v1645_v52 = vld [vmem:[%s5313_s15 + $0x70] sm:$0xff]  ;;  %v3733_v21 = vld [vmem:[%s5314_s16] ss:$0 sm:$0xff] }
 0x4bc   :  { %1687 = vmatpush.msra.mxu1 %v1645_v52 }
 0x4bd   :  { %v1528_v23 = vmul.f32 %v4529_v22, %v4529_v22 }
 0x4be   :  { %1688 = vmatpush.msra.mxu1 %v1644_v8  ;;  %v3529_v8 = vld [vmem:[%s5303_s5 + $0x118] sm:$0xff] }
 0x4bf   :  { %v1532_v24 = vsel %vm199_vm3, %v1528_v23, 0.0 }
 0x4c0   :  { %1533 = vadd.xlane.f32.xlu2 %v1532_v24  ;;  %1689 = vmatpush.msra.mxu1 %v1643_v9  ;;  %v3533_v9 = vld [vmem:[%s5303_s5 + $0x138] sm:$0xff] }
 0x4c2   :  { %1690 = vmatpush.msra.mxu1 %v1642_v10 }
 0x4c4   :  { %1691 = vmatpush.msra.mxu1 %v1641_v11  ;;  %v3528_v11 = vld [vmem:[%s5303_s5 + $0x110] sm:$0xff] }
 0x4c6   :  { %1692 = vmatpush.msra.mxu1 %v1640_v12  ;;  %v3532_v12 = vld [vmem:[%s5303_s5 + $0x130] sm:$0xff] }
 0x4c8   :  { %1693 = vmatpush.msra.mxu1 %v1639_v13 }
 0x51f   :  { %v1531_v29 = vpop.xlane.xlu1 %1530 }
 0x520   :  { %v1535_v30 = vmul.f32 %v1531_v29, %v4524_v15 }
 0x522   :  { %v1537_v31 = vadd.f32 1e-05, %v1535_v30 }
 0x524   :  { %3801 = vrsqrt.f32 %v1537_v31  ;;  %vm1545_vm6 = vweird.f32 %v1537_v31 }
 0x52a   :  { %v3802_v33 = vpop.eup %3801 }
 0x52b   :  { %v1540_v35 = vmul.f32 %v3802_v33, %v1537_v31  ;;  %vm1546_vm5 = vweird.f32 %v3802_v33 }
 0x52c   :  { %vm1547_vm7 = vmor %vm1545_vm6, %vm1546_vm5 }
 0x52d   :  { %v1541_v38 = vmul.f32 %v3802_v33, %v1540_v35 }
 0x52f   :  { %v1542_v39 = vmul.f32 0.5, %v1541_v38 }
 0x531   :  { %v1543_v42 = vsub.f32 1.5, %v1542_v39 }
 0x533   :  { %v1534_v44 = vpop.xlane.xlu2 %1533  ;;  %v1544_v46 = vmul.f32 %v3802_v33, %v1543_v42  ;;  %v3480_v42 = vld [vmem:[%s5327_s3 + $0x110] sm:$0xff] }
 0x534   :  { %v1536_v47 = vmul.f32 %v1534_v44, %v4524_v15  ;;  %1838 = vmatpush.msra.mxu2 %v3480_v42  ;;  %v3479_v44 = vld [vmem:[%s5327_s3 + $0x108] sm:$0xff] }
 0x535   :  { %v1548_v50 = vsel %vm1547_vm7, %v3802_v33, %v1544_v46  ;;  %v3483_v46 = vld [vmem:[%s5327_s3 + $0x128] sm:$0xff] }
 0x536   :  { %v1538_v51 = vadd.f32 1e-05, %v1536_v47  ;;  %v1559_v54 = vmul.f32 %v1548_v50, %v1525_v18  ;;  %1839 = vmatpush.msra.mxu2 %v3479_v44  ;;  %1859 = vmatpush.msra.mxu3 %v3483_v46  ;;  %v3478_v47 = vld [vmem:[%s5327_s3 + $0x100] sm:$0xff]  ;;  %v3493_v50 = vld [vmem:[%s5327_s3 + $0x178] sm:$0xff]  ;;  %v3540_v44 = vld [vmem:[%s5303_s5 + $0x170] sm:$0xff] }
 0x538   :  { %3803 = vrsqrt.f32 %v1538_v51  ;;  %v1564_v56 = vmul.f32 %v3730_v49, %v1559_v54  ;;  %vm1555_vm9 = vweird.f32 %v1538_v51  ;;  %1840 = vmatpush.msra.mxu2 %v3478_v47  ;;  %1860 = vmatpush.msra.mxu3 %v3482_v48  ;;  %v3535_v47 = vld [vmem:[%s5303_s5 + $0x148] sm:$0xff] }
 0x539   :  { %v3539_v48 = vld [vmem:[%s5303_s5 + $0x168] sm:$0xff] }
 0x53a   :  { %v1569_v57 = vadd.f32 %v3731_v55, %v1564_v56  ;;  %v3487_v56 = vld [vmem:[%s5327_s3 + $0x148] sm:$0xff] }
 0x53c   :  { %3474 = vmatmul.msk.f32.vlgmr.msrb.gmra.mxu2 %vm199_vm3, %v1569_v57 }
 0x53e   :  { %v3804_v58 = vpop.eup %3803 }
 0x53f   :  { %v1550_v59 = vmul.f32 %v3804_v58, %v1538_v51  ;;  %vm1556_vm8 = vweird.f32 %v3804_v58  ;;  %v3488_v51 = vld [vmem:[%s5327_s3 + $0x150] sm:$0xff] }
 0x540   :  { %vm1557_vm10 = vmor %vm1555_vm9, %vm1556_vm8 }
 0x541   :  { %v1551_v60 = vmul.f32 %v3804_v58, %v1550_v59  ;;  %v3486_v59 = vld [vmem:[%s5327_s3 + $0x140] sm:$0xff] }
 0x543   :  { %v1552_v61 = vmul.f32 0.5, %v1551_v60  ;;  %v3490_v60 = vld [vmem:[%s5327_s3 + $0x160] sm:$0xff] }
 0x545   :  { %v1553_v62 = vsub.f32 1.5, %v1552_v61  ;;  %v3497_v61 = vld [vmem:[%s5327_s3 + $0x198] sm:$0xff] }
 0x546   :  { %1920 = vmatpush.msrb.mxu0 %v3497_v61  ;;  %v3552_v61 = vld [vmem:[%s5303_s5 + $0x1d0] sm:$0xff] }
 0x547   :  { %v1554_v63 = vmul.f32 %v3804_v58, %v1553_v62  ;;  %v3501_v62 = vld [vmem:[%s5327_s3 + $0x1b8] sm:$0xff] }
 0x548   :  { %1940 = vmatpush.msrb.mxu1 %v3501_v62  ;;  %v3556_v62 = vld [vmem:[%s5303_s5 + $0x1f0] sm:$0xff] }
 0x549   :  { %v1558_v0 = vsel %vm1557_vm10, %v3804_v58, %v1554_v63 }
 0x54a   :  { %v1560_v1 = vmul.f32 %v1558_v0, %v4529_v22  ;;  %v3496_v0 = vld [vmem:[%s5327_s3 + $0x190] sm:$0xff] }
 0x54b   :  { %1921 = vmatpush.msrb.mxu0 %v3496_v0  ;;  %v3547_v0 = vld [vmem:[%s5303_s5 + $0x1a8] sm:$0xff] }
 0x54c   :  { %v1565_v2 = vmul.f32 %v3730_v49, %v1560_v1  ;;  %v3489_v49 = vld [vmem:[%s5327_s3 + $0x158] sm:$0xff]  ;;  %v3500_v1 = vld [vmem:[%s5327_s3 + $0x1b0] sm:$0xff] }
 0x54d   :  { %1877 = vmatpush.msrb.mxu2 %v3489_v49  ;;  %1941 = vmatpush.msrb.mxu1 %v3500_v1  ;;  %v3551_v1 = vld [vmem:[%s5303_s5 + $0x1c8] sm:$0xff] }
 0x54e   :  { %v1570_v3 = vadd.f32 %v3731_v55, %v1565_v2 }
 0x54f   :  { %1878 = vmatpush.msrb.mxu2 %v3488_v51  ;;  %1942 = vmatpush.msrb.mxu1 %v3499_v4  ;;  %v3538_v51 = vld [vmem:[%s5303_s5 + $0x160] sm:$0xff] }
 0x550   :  { %3475 = vmatmul.msk.f32.vlgmr.msrb.gmra.mxu3 %vm199_vm3, %v1570_v3  ;;  %v3546_v4 = vld [vmem:[%s5303_s5 + $0x1a0] sm:$0xff] }
 0x551   :  { %1897 = vmatpush.msrb.mxu3 %v3493_v50  ;;  %1879 = vmatpush.msrb.mxu2 %v3487_v56  ;;  %v3534_v50 = vld [vmem:[%s5303_s5 + $0x140] sm:$0xff]  ;;  %v3545_v56 = vld [vmem:[%s5303_s5 + $0x198] sm:$0xff] }
 0x552   :  { %1943 = vmatpush.msrb.mxu1 %v3498_v7  ;;  %v3577_v7 = vld [vmem:[%s5305_s7 + $0x118] sm:$0xff] }
 0x553   :  { %1898 = vmatpush.msrb.mxu3 %v3492_v53  ;;  %1880 = vmatpush.msrb.mxu2 %v3486_v59  ;;  %v3544_v59 = vld [vmem:[%s5303_s5 + $0x190] sm:$0xff] }
 0x5bf   :  { %v1603_v16 = vpop.f32.mrf.mxu2 }
 0x5c0   :  { %v1604_v17 = vadd.f32 %v3732_v14, %v1603_v16  ;;  %v4730_v16 = vld [vmem:[%s5315_s17] ss:$0 sm:$0xff] }
 0x5c2   :  { %v1629_v18 = vmax.f32 %v1604_v17, 0.0 }
 0x5c4   :  { %3476 = vmatmul.msk.f32.vlgmr.msra.gmra.mxu0 %vm1651_vm11, %v1629_v18 }
 0x5d3   :  { %v1626_v19 = vpop.f32.mrf.mxu3 }
 0x5d4   :  { %v1627_v45 = vadd.f32 %v3732_v14, %v1626_v19  ;;  %v3527_v14 = vld [vmem:[%s5303_s5 + $0x108] sm:$0xff] }
 0x5d5   :  { %v3531_v19 = vld [vmem:[%s5303_s5 + $0x128] sm:$0xff] }
 0x5d6   :  { %v1630_v20 = vmax.f32 %v1627_v45, 0.0  ;;  %v3526_v45 = vld [vmem:[%s5303_s5 + $0x100] sm:$0xff] }
 0x5d8   :  { %3477 = vmatmul.msk.f32.vlgmr.msra.gmra.mxu1 %vm1651_vm11, %v1630_v20  ;;  %v3530_v20 = vld [vmem:[%s5303_s5 + $0x120] sm:$0xff] }
 0x5d9   :  { %2086 = vmatpush.msra.mxu1 %v3533_v9  ;;  %v3589_v9 = vld [vmem:[%s5305_s7 + $0x178] sm:$0xff] }
 0x5db   :  { %2087 = vmatpush.msra.mxu1 %v3532_v12  ;;  %v3584_v12 = vld [vmem:[%s5305_s7 + $0x150] sm:$0xff] }
 0x5dd   :  { %2088 = vmatpush.msra.mxu1 %v3531_v19  ;;  %v3574_v19 = vld [vmem:[%s5305_s7 + $0x100] sm:$0xff] }
 0x5df   :  { %2089 = vmatpush.msra.mxu1 %v3530_v20  ;;  %v3582_v20 = vld [vmem:[%s5305_s7 + $0x140] sm:$0xff] }
 0x641   :  { %v1672_v22 = vpop.f32.mrf.mxu0 }
 0x642   :  { %v1673_v23 = vadd.f32 %v3733_v21, %v1672_v22 }
 0x644   :  { %v1698_v24 = vadd.f32 %v1673_v23, %v1569_v57  ;;  %v3491_v57 = vld [vmem:[%s5327_s3 + $0x168] sm:$0xff]  ;;  %v3735_v23 = vld [vmem:[%s5316_s18] ss:$0 sm:$0xff] }
 0x645   :  { %1899 = vmatpush.msrb.mxu3 %v3491_v57  ;;  %v3549_v57 = vld [vmem:[%s5303_s5 + $0x1b8] sm:$0xff] }
 0x646   :  { %v1702_v25 = vsel %vm199_vm3, %v1698_v24, 0.0 }
 0x647   :  { %1703 = vadd.xlane.f32.xlu0 %v1702_v25  ;;  %1900 = vmatpush.msrb.mxu3 %v3490_v60  ;;  %v3548_v60 = vld [vmem:[%s5303_s5 + $0x1b0] sm:$0xff] }
 0x655   :  { %v1695_v26 = vpop.f32.mrf.mxu1 }
 0x656   :  { %v1696_v27 = vadd.f32 %v3733_v21, %v1695_v26 }
 0x658   :  { %v1699_v28 = vadd.f32 %v1696_v27, %v1570_v3  ;;  %v3495_v3 = vld [vmem:[%s5327_s3 + $0x188] sm:$0xff]  ;;  %v3505_v27 = vld [vmem:[%s5327_s3 + $0x1d8] sm:$0xff] }
 0x659   :  { %1922 = vmatpush.msrb.mxu0 %v3495_v3  ;;  %v3542_v3 = vld [vmem:[%s5303_s5 + $0x180] sm:$0xff] }
 0x65a   :  { %v1705_v29 = vsel %vm199_vm3, %v1699_v28, 0.0 }
 0x65b   :  { %1706 = vadd.xlane.f32.xlu1 %v1705_v29  ;;  %1923 = vmatpush.msrb.mxu0 %v3494_v6  ;;  %v3504_v29 = vld [vmem:[%s5327_s3 + $0x1d0] sm:$0xff]  ;;  %v3554_v6 = vld [vmem:[%s5303_s5 + $0x1e0] sm:$0xff] }
 0x65d   :  { %2066 = vmatpush.msra.mxu0 %v3529_v8  ;;  %v3585_v8 = vld [vmem:[%s5305_s7 + $0x158] sm:$0xff] }
 0x65f   :  { %2067 = vmatpush.msra.mxu0 %v3528_v11  ;;  %v3580_v11 = vld [vmem:[%s5305_s7 + $0x130] sm:$0xff] }
 0x661   :  { %2068 = vmatpush.msra.mxu0 %v3527_v14  ;;  %v3575_v14 = vld [vmem:[%s5305_s7 + $0x108] sm:$0xff] }
 0x663   :  { %2069 = vmatpush.msra.mxu0 %v3526_v45  ;;  %v3578_v45 = vld [vmem:[%s5305_s7 + $0x120] sm:$0xff] }
 0x6ba   :  { %v1704_v30 = vpop.xlane.xlu0 %1703 }
 0x6bb   :  { %v1708_v31 = vmul.f32 %v1704_v30, %v4524_v15  ;;  %v3508_v30 = vld [vmem:[%s5327_s3 + $0x1f0] sm:$0xff] }
 0x6bd   :  { %v4628_v32 = vsub.f32 %v1698_v24, %v1708_v31 }
 0x6bf   :  { %v1712_v33 = vmul.f32 %v4628_v32, %v4628_v32 }
 0x6c1   :  { %v1714_v34 = vsel %vm199_vm3, %v1712_v33, 0.0  ;;  %v3503_v33 = vld [vmem:[%s5327_s3 + $0x1c8] sm:$0xff] }
 0x6c2   :  { %1715 = vadd.xlane.f32.xlu2 %v1714_v34  ;;  %v3507_v34 = vld [vmem:[%s5327_s3 + $0x1e8] sm:$0xff] }
 0x6ce   :  { %v1707_v35 = vpop.xlane.xlu1 %1706 }
 0x6cf   :  { %v1709_v36 = vmul.f32 %v1707_v35, %v4524_v15 }
 0x6d1   :  { %v4634_v37 = vsub.f32 %v1699_v28, %v1709_v36  ;;  %v3509_v28 = vld [vmem:[%s5327_s3 + $0x1f8] sm:$0xff]  ;;  %v3502_v36 = vld [vmem:[%s5327_s3 + $0x1c0] sm:$0xff] }
 0x6d3   :  { %v1713_v38 = vmul.f32 %v4634_v37, %v4634_v37 }
 0x6d5   :  { %v1717_v39 = vsel %vm199_vm3, %v1713_v38, 0.0  ;;  %v3506_v38 = vld [vmem:[%s5327_s3 + $0x1e0] sm:$0xff] }
 0x6d6   :  { %1718 = vadd.xlane.f32.xlu0 %v1717_v39 }
 0x735   :  { %v1716_v54 = vpop.xlane.xlu2 %1715 }
 0x736   :  { %v1720_v55 = vmul.f32 %v1716_v54, %v4524_v15 }
 0x738   :  { %v1722_v58 = vadd.f32 1e-05, %v1720_v55 }
 0x73a   :  { %3805 = vrsqrt.f32 %v1722_v58  ;;  %vm1730_vm13 = vweird.f32 %v1722_v58 }
 0x740   :  { %v3806_v63 = vpop.eup %3805 }
 0x741   :  { %v1725_v2 = vmul.f32 %v3806_v63, %v1722_v58  ;;  %vm1731_vm12 = vweird.f32 %v3806_v63  ;;  %v3557_v58 = vld [vmem:[%s5303_s5 + $0x1f8] sm:$0xff] }
 0x742   :  { %vm1732_vm14 = vmor %vm1730_vm13, %vm1731_vm12 }
 0x743   :  { %v1726_v5 = vmul.f32 %v3806_v63, %v1725_v2  ;;  %v3555_v2 = vld [vmem:[%s5303_s5 + $0x1e8] sm:$0xff] }
 0x745   :  { %v1727_v52 = vmul.f32 0.5, %v1726_v5  ;;  %v3550_v5 = vld [vmem:[%s5303_s5 + $0x1c0] sm:$0xff] }
 0x747   :  { %v1728_v10 = vsub.f32 1.5, %v1727_v52  ;;  %v3581_v52 = vld [vmem:[%s5305_s7 + $0x138] sm:$0xff] }
 0x749   :  { %v1719_v13 = vpop.xlane.xlu0 %1718  ;;  %v1729_v17 = vmul.f32 %v3806_v63, %v1728_v10  ;;  %v3576_v10 = vld [vmem:[%s5305_s7 + $0x110] sm:$0xff] }
 0x74a   :  { %v1721_v18 = vmul.f32 %v1719_v13, %v4524_v15  ;;  %v3588_v13 = vld [vmem:[%s5305_s7 + $0x170] sm:$0xff] }
 0x74b   :  { %v1733_v21 = vsel %vm1732_vm14, %v3806_v63, %v1729_v17  ;;  %v3543_v63 = vld [vmem:[%s5303_s5 + $0x188] sm:$0xff] }
 0x74c   :  { %v1723_v22 = vadd.f32 1e-05, %v1721_v18  ;;  %v1744_v24 = vmul.f32 %v1733_v21, %v4628_v32  ;;  %v3583_v17 = vld [vmem:[%s5305_s7 + $0x148] sm:$0xff]  ;;  %v3586_v21 = vld [vmem:[%s5305_s7 + $0x160] sm:$0xff] }
 0x74d   :  { %v3587_v18 = vld [vmem:[%s5305_s7 + $0x168] sm:$0xff] }
 0x74e   :  { %3807 = vrsqrt.f32 %v1723_v22  ;;  %v1749_v25 = vmul.f32 %v4730_v16, %v1744_v24  ;;  %vm1740_vm1 = vweird.f32 %v1723_v22  ;;  %v3601_v24 = vld [vmem:[%s5305_s7 + $0x1d8] sm:$0xff] }
 0x750   :  { %v4747_v26 = vadd.f32 %v3735_v23, %v1749_v25  ;;  %v3605_v25 = vld [vmem:[%s5305_s7 + $0x1f8] sm:$0xff] }
 0x752   :  { %3518 = vmatmul.msk.f32.vlgmr.msra.gmra.mxu2 %vm199_vm3, %v4747_v26  ;;  %3519 = vmatmul.msk.f32.vlgmr.msra.gmra.mxu3 %vm199_vm3, %v4747_v26 }
 0x753   :  { %1960 = vmatpush.msra.mxu2 %v3505_v27  ;;  %1980 = vmatpush.msra.mxu3 %v3509_v28  ;;  %v3592_v27 = vld [vmem:[%s5305_s7 + $0x190] sm:$0xff] }
 0x754   :  { %v3808_v31 = vpop.eup %3807  ;;  %v3596_v28 = vld [vmem:[%s5305_s7 + $0x1b0] sm:$0xff] }
 0x755   :  { %v1735_v32 = vmul.f32 %v3808_v31, %v1723_v22  ;;  %1961 = vmatpush.msra.mxu2 %v3504_v29  ;;  %1981 = vmatpush.msra.mxu3 %v3508_v30  ;;  %vm1741_vm15 = vweird.f32 %v3808_v31  ;;  %v3593_v22 = vld [vmem:[%s5305_s7 + $0x198] sm:$0xff]  ;;  %v3600_v29 = vld [vmem:[%s5305_s7 + $0x1d0] sm:$0xff] }
 0x756   :  { %vm1742_vm2 = vmor %vm1740_vm1, %vm1741_vm15  ;;  %v3604_v30 = vld [vmem:[%s5305_s7 + $0x1f0] sm:$0xff] }
 0x757   :  { %v1736_v35 = vmul.f32 %v3808_v31, %v1735_v32  ;;  %1962 = vmatpush.msra.mxu2 %v3503_v33  ;;  %1982 = vmatpush.msra.mxu3 %v3507_v34  ;;  %v3595_v32 = vld [vmem:[%s5305_s7 + $0x1a8] sm:$0xff] }
 0x758   :  { %v3599_v33 = vld [vmem:[%s5305_s7 + $0x1c8] sm:$0xff] }
 0x759   :  { %v1737_v39 = vmul.f32 0.5, %v1736_v35  ;;  %1963 = vmatpush.msra.mxu2 %v3502_v36  ;;  %1983 = vmatpush.msra.mxu3 %v3506_v38  ;;  %v3603_v34 = vld [vmem:[%s5305_s7 + $0x1e8] sm:$0xff]  ;;  %v3590_v35 = vld [vmem:[%s5305_s7 + $0x180] sm:$0xff] }
 0x75a   :  { %3520 = vmatmul.msk.f32.vlgmr.msrb.gmra.mxu2 %vm199_vm3, %v4747_v26  ;;  %3521 = vmatmul.msk.f32.vlgmr.msrb.gmra.mxu3 %vm199_vm3, %v4747_v26  ;;  %v3594_v36 = vld [vmem:[%s5305_s7 + $0x1a0] sm:$0xff] }
 0x75b   :  { %v1738_v42 = vsub.f32 1.5, %v1737_v39  ;;  %2106 = vmatpush.msrb.mxu2 %v3537_v40  ;;  %2126 = vmatpush.msrb.mxu3 %v3541_v41  ;;  %v3598_v38 = vld [vmem:[%s5305_s7 + $0x1c0] sm:$0xff] }
 0x75c   :  { %v3602_v39 = vld [vmem:[%s5305_s7 + $0x1e0] sm:$0xff] }
 0x75d   :  { %v1739_v46 = vmul.f32 %v3808_v31, %v1738_v42  ;;  %2107 = vmatpush.msrb.mxu2 %v3536_v43  ;;  %2127 = vmatpush.msrb.mxu3 %v3540_v44 }
 0x75f   :  { %v1743_v49 = vsel %vm1742_vm2, %v3808_v31, %v1739_v46  ;;  %2108 = vmatpush.msrb.mxu2 %v3535_v47  ;;  %2128 = vmatpush.msrb.mxu3 %v3539_v48  ;;  %v3591_v31 = vld [vmem:[%s5305_s7 + $0x188] sm:$0xff] }
 0x760   :  { %v1745_v53 = vmul.f32 %v1743_v49, %v4634_v37  ;;  %v3553_v37 = vld [vmem:[%s5303_s5 + $0x1d8] sm:$0xff]  ;;  %v3744_v47 = vld [vmem:[%s5304_s6 + $0x8] ss:$0 sm:$0xff]  ;;  %v3745_v48 = vld [vmem:[%s5304_s6 + $0x9] ss:$0 sm:$0xff] }
 0x761   :  { %2109 = vmatpush.msrb.mxu2 %v3534_v50  ;;  %2129 = vmatpush.msrb.mxu3 %v3538_v51  ;;  %v3736_v51 = vld [vmem:[%s5302_s4 + $0x8] ss:$0 sm:$0xff] }
 0x762   :  { %v1750_v54 = vmul.f32 %v4730_v16, %v1745_v53  ;;  %v3579_v16 = vld [vmem:[%s5305_s7 + $0x128] sm:$0xff] }
 0x763   :  { %v3737_v53 = vld [vmem:[%s5302_s4 + $0x9] ss:$0 sm:$0xff] }
 0x764   :  { %v4807_v55 = vadd.f32 %v3735_v23, %v1750_v54  ;;  %v3597_v23 = vld [vmem:[%s5305_s7 + $0x1b8] sm:$0xff]  ;;  %s3402_s7 = sshll.u32 %s5317_s19, 4  ;;  %s3403_s7 = int_to_ptr.hbm [resolvable:$true] %s3402_s7 }
 0x766   :  { %3522 = vmatmul.msk.f32.vlgmr.msrb.gmra.mxu0 %vm199_vm3, %v4807_v55  ;;  %3523 = vmatmul.msk.f32.vlgmr.msrb.gmra.mxu1 %vm199_vm3, %v4807_v55 }
 0x767   :  { %3524 = vmatmul.msk.f32.vlgmr.msra.gmra.mxu2 %vm199_vm3, %v4807_v55  ;;  %3525 = vmatmul.msk.f32.vlgmr.msra.gmra.mxu3 %vm199_vm3, %v4807_v55 }
 0x768   :  { %2146 = vmatpush.msrb.mxu0 %v3545_v56  ;;  %2166 = vmatpush.msrb.mxu1 %v3549_v57 }
 0x769   :  { %2186 = vmatpush.msra.mxu2 %v3553_v37  ;;  %2206 = vmatpush.msra.mxu3 %v3557_v58 }
 0x76a   :  { %2147 = vmatpush.msrb.mxu0 %v3544_v59  ;;  %2167 = vmatpush.msrb.mxu1 %v3548_v60  ;;  %v3746_v60 = vld [vmem:[%s5304_s6 + $0xa] ss:$0 sm:$0xff] }
 0x76b   :  { %2187 = vmatpush.msra.mxu2 %v3552_v61  ;;  %2207 = vmatpush.msra.mxu3 %v3556_v62  ;;  %v3747_v61 = vld [vmem:[%s5304_s6 + $0xb] ss:$0 sm:$0xff]  ;;  %v3748_v62 = vld [vmem:[%s5304_s6 + $0xc] ss:$0 sm:$0xff] }
 0x76c   :  { %2148 = vmatpush.msrb.mxu0 %v3543_v63  ;;  %2168 = vmatpush.msrb.mxu1 %v3547_v0  ;;  %v3749_v63 = vld [vmem:[%s5304_s6 + $0xd] ss:$0 sm:$0xff]  ;;  %v3738_v0 = vld [vmem:[%s5302_s4 + $0xa] ss:$0 sm:$0xff] }
 0x76d   :  { %2188 = vmatpush.msra.mxu2 %v3551_v1  ;;  %2208 = vmatpush.msra.mxu3 %v3555_v2  ;;  %v3739_v1 = vld [vmem:[%s5302_s4 + $0xb] ss:$0 sm:$0xff] }
 0x76e   :  { %3566 = vmatmul.msk.f32.vlgmr.msra.gmra.mxu0 %vm199_vm3, %v4747_v26  ;;  %3567 = vmatmul.msk.f32.vlgmr.msra.gmra.mxu1 %vm199_vm3, %v4747_v26 }
 0x76f   :  { %3568 = vmatmul.msk.f32.vlgmr.msrb.gmra.mxu2 %vm199_vm3, %v4747_v26  ;;  %3569 = vmatmul.msk.f32.vlgmr.msrb.gmra.mxu3 %vm199_vm3, %v4747_v26 }
 0x770   :  { %2149 = vmatpush.msrb.mxu0 %v3542_v3  ;;  %2169 = vmatpush.msrb.mxu1 %v3546_v4  ;;  %v3740_v4 = vld [vmem:[%s5302_s4 + $0xc] ss:$0 sm:$0xff] }
 0x771   :  { %2189 = vmatpush.msra.mxu2 %v3550_v5  ;;  %2209 = vmatpush.msra.mxu3 %v3554_v6  ;;  %v3741_v5 = vld [vmem:[%s5302_s4 + $0xd] ss:$0 sm:$0xff] }
 0x772   :  { %2292 = vmatpush.msra.mxu0 %v3577_v7  ;;  %2312 = vmatpush.msra.mxu1 %v3581_v52 }
 0x773   :  { %2332 = vmatpush.msrb.mxu2 %v3585_v8  ;;  %2352 = vmatpush.msrb.mxu3 %v3589_v9 }
 0x774   :  { %2293 = vmatpush.msra.mxu0 %v3576_v10  ;;  %2313 = vmatpush.msra.mxu1 %v3580_v11 }
 0x775   :  { %2333 = vmatpush.msrb.mxu2 %v3584_v12  ;;  %2353 = vmatpush.msrb.mxu3 %v3588_v13 }
 0x776   :  { %3570 = vmatmul.msk.f32.vlgmr.msrb.gmra.mxu0 %vm199_vm3, %v4807_v55  ;;  %3571 = vmatmul.msk.f32.vlgmr.msrb.gmra.mxu1 %vm199_vm3, %v4807_v55 }
 0x777   :  { %3572 = vmatmul.msk.f32.vlgmr.msra.gmra.mxu2 %vm199_vm3, %v4807_v55  ;;  %3573 = vmatmul.msk.f32.vlgmr.msra.gmra.mxu3 %vm199_vm3, %v4807_v55 }
 0x778   :  { %2294 = vmatpush.msra.mxu0 %v3575_v14  ;;  %2314 = vmatpush.msra.mxu1 %v3579_v16  ;;  %v3750_v16 = vld [vmem:[%s5304_s6 + $0xe] ss:$0 sm:$0xff] }
 0x779   :  { %2334 = vmatpush.msrb.mxu2 %v3583_v17  ;;  %2354 = vmatpush.msrb.mxu3 %v3587_v18  ;;  %v3751_v17 = vld [vmem:[%s5304_s6 + $0xf] ss:$0 sm:$0xff]  ;;  %v3752_v18 = vld [vmem:[%s5306_s8 + $0x8] ss:$0 sm:$0xff] }
 0x77a   :  { %2295 = vmatpush.msra.mxu0 %v3574_v19  ;;  %2315 = vmatpush.msra.mxu1 %v3578_v45  ;;  %v3753_v19 = vld [vmem:[%s5306_s8 + $0x9] ss:$0 sm:$0xff]  ;;  %v3742_v45 = vld [vmem:[%s5302_s4 + $0xe] ss:$0 sm:$0xff] }
 0x77b   :  { %2335 = vmatpush.msrb.mxu2 %v3582_v20  ;;  %2355 = vmatpush.msrb.mxu3 %v3586_v21  ;;  %v3743_v20 = vld [vmem:[%s5302_s4 + $0xf] ss:$0 sm:$0xff] }
 0x77c   :  { %2372 = vmatpush.msrb.mxu0 %v3593_v22  ;;  %2392 = vmatpush.msrb.mxu1 %v3597_v23 }
 0x77d   :  { %2412 = vmatpush.msra.mxu2 %v3601_v24  ;;  %2432 = vmatpush.msra.mxu3 %v3605_v25 }
 0x77e   :  { %3614 = vmatmul.msk.f32.vlgmr.msra.gmra.mxu0 %vm199_vm3, %v4747_v26  ;;  %3615 = vmatmul.msk.f32.vlgmr.msra.gmra.mxu1 %vm199_vm3, %v4747_v26 }
 0x77f   :  { %3616 = vmatmul.msk.f32.vlgmr.msrb.gmra.mxu2 %vm199_vm3, %v4747_v26  ;;  %3617 = vmatmul.msk.f32.vlgmr.msrb.gmra.mxu3 %vm199_vm3, %v4747_v26 }
 0x780   :  { %2373 = vmatpush.msrb.mxu0 %v3592_v27  ;;  %2393 = vmatpush.msrb.mxu1 %v3596_v28 }
 0x781   :  { %2413 = vmatpush.msra.mxu2 %v3600_v29  ;;  %2433 = vmatpush.msra.mxu3 %v3604_v30 }
 0x782   :  { %2374 = vmatpush.msrb.mxu0 %v3591_v31  ;;  %2394 = vmatpush.msrb.mxu1 %v3595_v32  ;;  %v3754_v32 = vld [vmem:[%s5306_s8 + $0xa] ss:$0 sm:$0xff] }
 0x783   :  { %2414 = vmatpush.msra.mxu2 %v3599_v33  ;;  %2434 = vmatpush.msra.mxu3 %v3603_v34  ;;  %v3755_v33 = vld [vmem:[%s5306_s8 + $0xb] ss:$0 sm:$0xff]  ;;  %v3756_v34 = vld [vmem:[%s5306_s8 + $0xc] ss:$0 sm:$0xff] }
 0x784   :  { %2375 = vmatpush.msrb.mxu0 %v3590_v35  ;;  %2395 = vmatpush.msrb.mxu1 %v3594_v36  ;;  %v3757_v35 = vld [vmem:[%s5306_s8 + $0xd] ss:$0 sm:$0xff] }
 0x785   :  { %2415 = vmatpush.msra.mxu2 %v3598_v38  ;;  %2435 = vmatpush.msra.mxu3 %v3602_v39 }
 0x786   :  { %3618 = vmatmul.msk.f32.vlgmr.msrb.gmra.mxu0 %vm199_vm3, %v4807_v55  ;;  %3619 = vmatmul.msk.f32.vlgmr.msrb.gmra.mxu1 %vm199_vm3, %v4807_v55 }
 0x787   :  { %3620 = vmatmul.msk.f32.vlgmr.msra.gmra.mxu2 %vm199_vm3, %v4807_v55  ;;  %3621 = vmatmul.msk.f32.vlgmr.msra.gmra.mxu3 %vm199_vm3, %v4807_v55 }
 0x7d5   :  { %v1842_v40 = vpop.f32.mrf.mxu2  ;;  %v1862_v41 = vpop.f32.mrf.mxu3 }
 0x7d6   :  { %v1843_v58 = vadd.f32 %v3736_v51, %v1842_v40  ;;  %v1863_v59 = vadd.f32 %v3737_v53, %v1862_v41 }
 0x7dd   :  { %v1882_v42 = vpop.f32.mrf.mxu2  ;;  %v1902_v43 = vpop.f32.mrf.mxu3 }
 0x7de   :  { %v1883_v11 = vadd.f32 %v3738_v0, %v1882_v42  ;;  %v1903_v12 = vadd.f32 %v3739_v1, %v1902_v43  ;;  %v3852_v1 = vld [vmem:[%s5328_s28] sm:$0xff] }
 0x7e3   :  { %v1925_v44 = vpop.f32.mrf.mxu0  ;;  %v1945_v46 = vpop.f32.mrf.mxu1 }
 0x7e4   :  { %v1926_v13 = vadd.f32 %v3740_v4, %v1925_v44  ;;  %v1946_v14 = vadd.f32 %v3741_v5, %v1945_v46  ;;  %v3758_v46 = vld [vmem:[%s5306_s8 + $0xe] ss:$0 sm:$0xff]  ;;  %v3853_v4 = vld [vmem:[%s5328_s28 + $0x30] sm:$0xff] }
 0x7ea   :  { %v1965_v49 = vpop.f32.mrf.mxu2  ;;  %v1985_v50 = vpop.f32.mrf.mxu3 }
 0x7eb   :  { %v2071_v54 = vpop.f32.mrf.mxu0  ;;  %v2091_v56 = vpop.f32.mrf.mxu1  ;;  %v1966_v30 = vadd.f32 %v3742_v45, %v1965_v49  ;;  %v1986_v31 = vadd.f32 %v3743_v20, %v1985_v50 }
 0x7ec   :  { %v2072_v57 = vadd.f32 %v3744_v47, %v2071_v54  ;;  %v2092_v37 = vadd.f32 %v3745_v48, %v2091_v56  ;;  %v3759_v47 = vld [vmem:[%s5306_s8 + $0xf] ss:$0 sm:$0xff]  ;;  %v3849_v56 = vld [vmem:[%s5328_s28 + $0x10] sm:$0xff]  ;;  %s3889_s8 = smov 8  }
 0x7ee   :  { %3622 = vmatpush.xpose.msk.msra.mxu0 %vm80_vm0, %v2072_v57  ;;  %3624 = vmatpush.xpose.msk.msra.mxu1 %vm80_vm0, %v2092_v37  ;;  %v3850_v37 = vld [vmem:[%s5328_s28 + $0x18] sm:$0xff] }
 0x7f1   :  { %3623 = vmatmul.msk.f32.vlgmr.msra.gmra.mxu0 %vm80_vm0, %v1843_v58  ;;  %3625 = vmatmul.msk.f32.vlgmr.msra.gmra.mxu1 %vm80_vm0, %v1863_v59 }
 0x7f2   :  { %v2111_v2 = vpop.f32.mrf.mxu2  ;;  %v2131_v3 = vpop.f32.mrf.mxu3 }
 0x7f3   :  { %v2112_v6 = vadd.f32 %v3746_v60, %v2111_v2  ;;  %v2132_v7 = vadd.f32 %v3747_v61, %v2131_v3  ;;  %v2151_v52 = vpop.f32.mrf.mxu0  ;;  %v2171_v8 = vpop.f32.mrf.mxu1 }
 0x7f4   :  { %v2152_v9 = vadd.f32 %v3748_v62, %v2151_v52  ;;  %v2172_v10 = vadd.f32 %v3749_v63, %v2171_v8  ;;  %v3851_v63 = vld [vmem:[%s5328_s28 + $0x8] sm:$0xff] }
 0x7f5   :  { %3626 = vmatpush.xpose.msk.msrb.mxu2 %vm80_vm0, %v2112_v6  ;;  %3628 = vmatpush.xpose.msk.msrb.mxu3 %vm80_vm0, %v2132_v7 }
 0x7f6   :  { %3630 = vmatpush.xpose.msk.msrb.mxu0 %vm80_vm0, %v2152_v9  ;;  %3632 = vmatpush.xpose.msk.msrb.mxu1 %vm80_vm0, %v2172_v10 }
 0x7f8   :  { %3627 = vmatmul.msk.f32.vlgmr.msrb.gmra.mxu2 %vm80_vm0, %v1883_v11  ;;  %3629 = vmatmul.msk.f32.vlgmr.msrb.gmra.mxu3 %vm80_vm0, %v1903_v12  ;;  %v3854_v11 = vld [vmem:[%s5328_s28 + $0x28] sm:$0xff] }
 0x7f9   :  { %3631 = vmatmul.msk.f32.vlgmr.msrb.gmra.mxu0 %vm80_vm0, %v1926_v13  ;;  %3633 = vmatmul.msk.f32.vlgmr.msrb.gmra.mxu1 %vm80_vm0, %v1946_v14  ;;  %v3855_v13 = vld [vmem:[%s5328_s28 + $0x38] sm:$0xff] }
 0x7fa   :  { %v2191_v21 = vpop.f32.mrf.mxu2  ;;  %v2211_v22 = vpop.f32.mrf.mxu3 }
 0x7fb   :  { %v2192_v23 = vadd.f32 %v3750_v16, %v2191_v21  ;;  %v2212_v24 = vadd.f32 %v3751_v17, %v2211_v22  ;;  %v2297_v25 = vpop.f32.mrf.mxu0  ;;  %v2317_v27 = vpop.f32.mrf.mxu1  ;;  %v3856_v16 = vld [vmem:[%s5328_s28 + $0x20] sm:$0xff] }
 0x7fc   :  { %v2298_v28 = vadd.f32 %v3752_v18, %v2297_v25  ;;  %v2318_v29 = vadd.f32 %v3753_v19, %v2317_v27 }
 0x7fd   :  { %3634 = vmatpush.xpose.msk.msra.mxu2 %vm80_vm0, %v2192_v23  ;;  %3636 = vmatpush.xpose.msk.msra.mxu3 %vm80_vm0, %v2212_v24 }
 0x7fe   :  { %2754 = vmatpush.msra.mxu0 %v2298_v28  ;;  %2777 = vmatpush.msra.mxu1 %v2318_v29 }
 0x800   :  { %3635 = vmatmul.msk.f32.vlgmr.msra.gmra.mxu2 %vm80_vm0, %v1966_v30  ;;  %3637 = vmatmul.msk.f32.vlgmr.msra.gmra.mxu3 %vm80_vm0, %v1986_v31 }
 0x802   :  { %v2337_v36 = vpop.f32.mrf.mxu2  ;;  %v2357_v38 = vpop.f32.mrf.mxu3 }
 0x803   :  { %v2338_v39 = vadd.f32 %v3754_v32, %v2337_v36  ;;  %v2358_v40 = vadd.f32 %v3755_v33, %v2357_v38  ;;  %v2377_v41 = vpop.f32.mrf.mxu0  ;;  %v2397_v42 = vpop.f32.mrf.mxu1 }
 0x804   :  { %v2378_v43 = vadd.f32 %v3756_v34, %v2377_v41  ;;  %v2398_v44 = vadd.f32 %v3757_v35, %v2397_v42 }
 0x805   :  { %2800 = vmatpush.msrb.mxu2 %v2338_v39  ;;  %2823 = vmatpush.msrb.mxu3 %v2358_v40 }
 0x806   :  { %2846 = vmatpush.msrb.mxu0 %v2378_v43  ;;  %2869 = vmatpush.msrb.mxu1 %v2398_v44 }
 0x80a   :  { %v2417_v48 = vpop.f32.mrf.mxu2  ;;  %v2437_v49 = vpop.f32.mrf.mxu3 }
 0x80b   :  { %v2418_v50 = vadd.f32 %v3758_v46, %v2417_v48  ;;  %v2438_v51 = vadd.f32 %v3759_v47, %v2437_v49 }
 0x80d   :  { %2892 = vmatpush.msra.mxu2 %v2418_v50  ;;  %2915 = vmatpush.msra.mxu3 %v2438_v51 }
 0x86e   :  { %v2489_v59 = vpop.f32.mrf.mxu1  ;;  %v2463_v60 = vpop.f32.mrf.mxu0 }
 0x86f   :  { %v2490_v0 = vadd.f32 %v3851_v63, %v2489_v59  ;;  %v2464_v2 = vadd.f32 %v3852_v1, %v2463_v60 }
 0x871   :  { %v2651_v7 = vsel %vm80_vm0, %v2490_v0, -inf  ;;  %v2648_v9 = vsel %vm80_vm0, %v2464_v2, -inf }
 0x876   :  { %v2593_v52 = vpop.f32.mrf.mxu1  ;;  %v2567_v10 = vpop.f32.mrf.mxu0 }
 0x877   :  { %v2594_v12 = vadd.f32 %v3854_v11, %v2593_v52  ;;  %v2568_v17 = vadd.f32 %v3856_v16, %v2567_v10  ;;  %v3648_v52 = vld [vmem:[%s5307_s9 + $0x50] sm:$0xff] }
 0x879   :  { %v2663_v19 = vsel %vm80_vm0, %v2594_v12, -inf  ;;  %v2660_v45 = vsel %vm80_vm0, %v2568_v17, -inf }
 0x87b   :  { %v2515_v53 = vpop.f32.mrf.mxu2  ;;  %v2541_v54 = vpop.f32.mrf.mxu3 }
 0x87c   :  { %v2516_v57 = vadd.f32 %v3849_v56, %v2515_v53  ;;  %v2542_v58 = vadd.f32 %v3850_v37, %v2541_v54 }
 0x87e   :  { %v2657_v61 = vsel %vm80_vm0, %v2542_v58, -inf  ;;  %v2654_v62 = vsel %vm80_vm0, %v2516_v57, -inf }
 0x87f   :  { %2658 = vmax.xlane.f32.xlu2 %v2657_v61  ;;  %2655 = vmax.xlane.f32.xlu1 %v2654_v62 }
 0x883   :  { %v2619_v3 = vpop.f32.mrf.mxu2  ;;  %v2645_v8 = vpop.f32.mrf.mxu3 }
 0x884   :  { %v2620_v5 = vadd.f32 %v3853_v4, %v2619_v3  ;;  %v2646_v14 = vadd.f32 %v3855_v13, %v2645_v8 }
 0x886   :  { %v2666_v6 = vsel %vm80_vm0, %v2620_v5, -inf  ;;  %v2669_v18 = vsel %vm80_vm0, %v2646_v14, -inf }
 0x887   :  { %2667 = vmax.xlane.f32.xlu0 %v2666_v6  ;;  %2652 = vmax.xlane.f32.xlu2 %v2651_v7 }
 0x888   :  { %2649 = vmax.xlane.f32.xlu1 %v2648_v9 }
 0x88f   :  { %2670 = vmax.xlane.f32.xlu0 %v2669_v18  ;;  %2664 = vmax.xlane.f32.xlu2 %v2663_v19 }
 0x890   :  { %2661 = vmax.xlane.f32.xlu1 %v2660_v45 }
 0x8f2   :  { %v2659_v20 = vpop.xlane.xlu2 %2658  ;;  %v2656_v21 = vpop.xlane.xlu1 %2655 }
 0x8f3   :  { %v2675_v22 = vsub.f32 %v2542_v58, %v2659_v20  ;;  %v2674_v23 = vsub.f32 %v2516_v57, %v2656_v21 }
 0x8f5   :  { %v2686_v24 = vmul.f32 1.442695, %v2675_v22  ;;  %v2684_v25 = vmul.f32 1.442695, %v2674_v23 }
 0x8f7   :  { %3809 = vpow2.f32 %v2686_v24  ;;  %v3649_v24 = vld [vmem:[%s5307_s9 + $0x58] sm:$0xff] }
 0x8f8   :  { %3811 = vpow2.f32 %v2684_v25  ;;  %v3646_v25 = vld [vmem:[%s5307_s9 + $0x40] sm:$0xff] }
 0x8fa   :  { %v2668_v27 = vpop.xlane.xlu0 %2667  ;;  %v2653_v28 = vpop.xlane.xlu2 %2652 }
 0x8fb   :  { %v2678_v29 = vsub.f32 %v2620_v5, %v2668_v27  ;;  %v2673_v30 = vsub.f32 %v2490_v0, %v2653_v28  ;;  %v2650_v31 = vpop.xlane.xlu1 %2649  ;;  %v3647_v27 = vld [vmem:[%s5307_s9 + $0x48] sm:$0xff]  ;;  %v3652_v28 = vld [vmem:[%s5307_s9 + $0x70] sm:$0xff] }
 0x8fc   :  { %v2672_v32 = vsub.f32 %v2464_v2, %v2650_v31  ;;  %v3653_v31 = vld [vmem:[%s5307_s9 + $0x78] sm:$0xff] }
 0x8fd   :  { %v3810_v33 = vpop.eup %3809  ;;  %v2692_v34 = vmul.f32 1.442695, %v2678_v29  ;;  %v2682_v35 = vmul.f32 1.442695, %v2673_v30  ;;  %v3650_v29 = vld [vmem:[%s5307_s9 + $0x60] sm:$0xff]  ;;  %v3651_v30 = vld [vmem:[%s5307_s9 + $0x68] sm:$0xff] }
 0x8fe   :  { %v3812_v36 = vpop.eup %3811  ;;  %v2680_v38 = vmul.f32 1.442695, %v2672_v32  ;;  %v2705_v39 = vsel %vm80_vm0, %v3810_v33, 0.0 }
 0x8ff   :  { %3813 = vpow2.f32 %v2692_v34  ;;  %v2702_v40 = vsel %vm80_vm0, %v3812_v36, 0.0  ;;  %2706 = vadd.xlane.f32.xlu1 %v2705_v39 }
 0x900   :  { %3815 = vpow2.f32 %v2682_v35  ;;  %2703 = vadd.xlane.f32.xlu0 %v2702_v40 }
 0x901   :  { %3817 = vpow2.f32 %v2680_v38 }
 0x902   :  { %v2671_v41 = vpop.xlane.xlu0 %2670  ;;  %v2665_v42 = vpop.xlane.xlu2 %2664 }
 0x903   :  { %v2679_v43 = vsub.f32 %v2646_v14, %v2671_v41  ;;  %v2677_v44 = vsub.f32 %v2594_v12, %v2665_v42  ;;  %v2662_v46 = vpop.xlane.xlu1 %2661 }
 0x904   :  { %v2676_v47 = vsub.f32 %v2568_v17, %v2662_v46 }
 0x905   :  { %v3814_v48 = vpop.eup %3813  ;;  %v2694_v49 = vmul.f32 1.442695, %v2679_v43  ;;  %v2690_v50 = vmul.f32 1.442695, %v2677_v44 }
 0x906   :  { %v3816_v51 = vpop.eup %3815  ;;  %v2688_v53 = vmul.f32 1.442695, %v2676_v47  ;;  %v2714_v54 = vsel %vm80_vm0, %v3814_v48, 0.0 }
 0x907   :  { %v3818_v56 = vpop.eup %3817  ;;  %3819 = vpow2.f32 %v2694_v49  ;;  %2715 = vadd.xlane.f32.xlu2 %v2714_v54  ;;  %v2699_v57 = vsel %vm80_vm0, %v3816_v51, 0.0 }
 0x908   :  { %3821 = vpow2.f32 %v2690_v50  ;;  %v2696_v37 = vsel %vm80_vm0, %v3818_v56, 0.0  ;;  %2700 = vadd.xlane.f32.xlu1 %v2699_v57 }
 0x909   :  { %3823 = vpow2.f32 %v2688_v53  ;;  %2697 = vadd.xlane.f32.xlu0 %v2696_v37 }
 0x90d   :  { %v3820_v58 = vpop.eup %3819 }
 0x90e   :  { %v3822_v59 = vpop.eup %3821  ;;  %v2717_v60 = vsel %vm80_vm0, %v3820_v58, 0.0 }
 0x90f   :  { %v3824_v61 = vpop.eup %3823  ;;  %2718 = vadd.xlane.f32.xlu2 %v2717_v60  ;;  %v2711_v62 = vsel %vm80_vm0, %v3822_v59, 0.0 }
 0x910   :  { %2712 = vadd.xlane.f32.xlu1 %v2711_v62  ;;  %v2708_v63 = vsel %vm80_vm0, %v3824_v61, 0.0 }
 0x911   :  { %2709 = vadd.xlane.f32.xlu0 %v2708_v63 }
 0x972   :  { %v2707_v0 = vpop.xlane.xlu1 %2706 }
 0x973   :  { %v2704_v1 = vpop.xlane.xlu0 %2703  ;;  %3825 = vrcp.f32 %v2707_v0 }
 0x974   :  { %3827 = vrcp.f32 %v2704_v1 }
 0x979   :  { %v3826_v2 = vpop.eup %3825 }
 0x97a   :  { %v3828_v3 = vpop.eup %3827  ;;  %v2731_v4 = vmul.f32 %v3826_v2, %v3810_v33  ;;  %v2716_v5 = vpop.xlane.xlu2 %2715 }
 0x97b   :  { %v2730_v6 = vmul.f32 %v3828_v3, %v3812_v36  ;;  %3829 = vrcp.f32 %v2716_v5  ;;  %v2701_v7 = vpop.xlane.xlu1 %2700 }
 0x97c   :  { %v2698_v8 = vpop.xlane.xlu0 %2697  ;;  %3831 = vrcp.f32 %v2701_v7  ;;  %3641 = vmatmul.msk.f32.vlgmr.msrb.gmra.mxu3 %vm80_vm0, %v2731_v4 }
 0x97d   :  { %3833 = vrcp.f32 %v2698_v8  ;;  %3640 = vmatmul.msk.f32.vlgmr.msrb.gmra.mxu2 %vm80_vm0, %v2730_v6  ;;  %3016 = vmatpush.msrb.mxu3 %v3649_v24  ;;  %v3672_v24 = vld [vmem:[%s5311_s13 + $0x78] sm:$0xff] }
 0x97e   :  { %2993 = vmatpush.msrb.mxu2 %v3648_v52 }
 0x981   :  { %v3830_v9 = vpop.eup %3829 }
 0x982   :  { %v3832_v10 = vpop.eup %3831  ;;  %v2734_v11 = vmul.f32 %v3830_v9, %v3814_v48  ;;  %v2719_v12 = vpop.xlane.xlu2 %2718 }
 0x983   :  { %v3834_v13 = vpop.eup %3833  ;;  %v2729_v14 = vmul.f32 %v3832_v10, %v3816_v51  ;;  %3835 = vrcp.f32 %v2719_v12  ;;  %v2713_v16 = vpop.xlane.xlu1 %2712  ;;  %v3760_v51 = vld [vmem:[%s5308_s10 + $0x1] ss:$0 sm:$0xff] }
 0x984   :  { %v2728_v17 = vmul.f32 %v3834_v13, %v3818_v56  ;;  %v2710_v18 = vpop.xlane.xlu0 %2709  ;;  %3837 = vrcp.f32 %v2713_v16 }
 0x985   :  { %3839 = vrcp.f32 %v2710_v18  ;;  %3639 = vmatmul.msk.f32.vlgmr.msra.gmra.mxu1 %vm80_vm0, %v2729_v14  ;;  %3644 = vmatmul.msk.f32.vlgmr.msra.gmra.mxu2 %vm80_vm0, %v2734_v11  ;;  %v3668_v18 = vld [vmem:[%s5311_s13 + $0x58] sm:$0xff] }
 0x986   :  { %3638 = vmatmul.msk.f32.vlgmr.msra.gmra.mxu0 %vm80_vm0, %v2728_v17  ;;  %2970 = vmatpush.msra.mxu1 %v3647_v27  ;;  %v3670_v27 = vld [vmem:[%s5311_s13 + $0x68] sm:$0xff] }
 0x987   :  { %2947 = vmatpush.msra.mxu0 %v3646_v25  ;;  %3085 = vmatpush.msra.mxu2 %v3652_v28  ;;  %v3671_v25 = vld [vmem:[%s5311_s13 + $0x70] sm:$0xff]  ;;  %v3669_v28 = vld [vmem:[%s5311_s13 + $0x60] sm:$0xff] }
 0x989   :  { %v3836_v19 = vpop.eup %3835 }
 0x98a   :  { %v3838_v45 = vpop.eup %3837  ;;  %v2735_v20 = vmul.f32 %v3836_v19, %v3820_v58  ;;  %v3667_v19 = vld [vmem:[%s5311_s13 + $0x50] sm:$0xff] }
 0x98b   :  { %v3840_v21 = vpop.eup %3839  ;;  %v2733_v22 = vmul.f32 %v3838_v45, %v3822_v59  ;;  %v3666_v45 = vld [vmem:[%s5311_s13 + $0x48] sm:$0xff] }
 0x98c   :  { %v2732_v23 = vmul.f32 %v3840_v21, %v3824_v61  ;;  %3645 = vmatmul.msk.f32.vlgmr.msra.gmra.mxu3 %vm80_vm0, %v2735_v20  ;;  %v3665_v20 = vld [vmem:[%s5311_s13 + $0x40] sm:$0xff] }
 0x98d   :  { %3643 = vmatmul.msk.f32.vlgmr.msrb.gmra.mxu1 %vm80_vm0, %v2733_v22  ;;  %3108 = vmatpush.msra.mxu3 %v3653_v31 }
 0x98e   :  { %3642 = vmatmul.msk.f32.vlgmr.msrb.gmra.mxu0 %vm80_vm0, %v2732_v23  ;;  %3062 = vmatpush.msrb.mxu1 %v3651_v30  ;;  %v3682_v30 = vld [vmem:[%s5313_s15 + $0xb0] sm:$0xff] }
 0x98f   :  { %3039 = vmatpush.msrb.mxu0 %v3650_v29  ;;  %v3683_v29 = vld [vmem:[%s5313_s15 + $0xb8] sm:$0xff] }
 0x9ff   :  { %v2825_v32 = vpop.f32.mrf.mxu3 }
 0xa00   :  { %v2802_v33 = vpop.f32.mrf.mxu2  ;;  %3657 = vmatmul.msk.f32.vlgmr.msrb.gmra.mxu3 %vm80_vm0, %v2825_v32 }
 0xa01   :  { %3656 = vmatmul.msk.f32.vlgmr.msrb.gmra.mxu2 %vm80_vm0, %v2802_v33  ;;  %v3681_v33 = vld [vmem:[%s5313_s15 + $0xa8] sm:$0xff] }
 0xa02   :  { %v2779_v34 = vpop.f32.mrf.mxu1  ;;  %3289 = vmatpush.msrb.mxu2 %v3683_v29 }
 0xa03   :  { %v2756_v35 = vpop.f32.mrf.mxu0  ;;  %3655 = vmatmul.msk.f32.vlgmr.msra.gmra.mxu1 %vm80_vm0, %v2779_v34 }
 0xa04   :  { %3654 = vmatmul.msk.f32.vlgmr.msra.gmra.mxu0 %vm80_vm0, %v2756_v35  ;;  %3246 = vmatpush.msra.mxu1 %v3672_v24 }
 0xa05   :  { %3223 = vmatpush.msra.mxu0 %v3668_v18  ;;  %3290 = vmatpush.msrb.mxu2 %v3682_v30 }
 0xa06   :  { %3247 = vmatpush.msra.mxu1 %v3671_v25 }
 0xa07   :  { %3224 = vmatpush.msra.mxu0 %v3667_v19  ;;  %3291 = vmatpush.msrb.mxu2 %v3681_v33 }
 0xa08   :  { %v2894_v36 = vpop.f32.mrf.mxu2  ;;  %3248 = vmatpush.msra.mxu1 %v3670_v27 }
 0xa09   :  { %3660 = vmatmul.msk.f32.vlgmr.msra.gmra.mxu2 %vm80_vm0, %v2894_v36  ;;  %3225 = vmatpush.msra.mxu0 %v3666_v45 }
 0xa0a   :  { %v2871_v38 = vpop.f32.mrf.mxu1  ;;  %3249 = vmatpush.msra.mxu1 %v3669_v28 }
 0xa0b   :  { %v2848_v39 = vpop.f32.mrf.mxu0  ;;  %3659 = vmatmul.msk.f32.vlgmr.msrb.gmra.mxu1 %vm80_vm0, %v2871_v38  ;;  %3226 = vmatpush.msra.mxu0 %v3665_v20  ;;  %v3680_v38 = vld [vmem:[%s5313_s15 + $0xa0] sm:$0xff] }
 0xa0c   :  { %3658 = vmatmul.msk.f32.vlgmr.msrb.gmra.mxu0 %vm80_vm0, %v2848_v39  ;;  %3292 = vmatpush.msrb.mxu2 %v3680_v38 }
 0xa0f   :  { %v2917_v40 = vpop.f32.mrf.mxu3 }
 0xa10   :  { %3661 = vmatmul.msk.f32.vlgmr.msra.gmra.mxu3 %vm80_vm0, %v2917_v40 }
 0xa80   :  { %v2972_v41 = vpop.f32.mrf.mxu1 }
 0xa81   :  { %v2949_v42 = vpop.f32.mrf.mxu0  ;;  %v3114_v43 = vsel %vm199_vm3, %v2972_v41, 0.0  ;;  %v3679_v41 = vld [vmem:[%s5313_s15 + $0x98] sm:$0xff] }
 0xa82   :  { %v3113_v44 = vsel %vm199_vm3, %v2949_v42, 0.0  ;;  %3293 = vmatpush.msrb.mxu2 %v3679_v41 }
 0xa83   :  { %v3115_v46 = vadd.f32 %v3114_v43, %v3113_v44  ;;  %v3018_v48 = vpop.f32.mrf.mxu3  ;;  %v3761_v44 = vld [vmem:[%s5309_s11 + $0x1] ss:$0 sm:$0xff] }
 0xa84   :  { %v2995_v47 = vpop.f32.mrf.mxu2  ;;  %v3118_v53 = vsel %vm199_vm3, %v3018_v48, 0.0 }
 0xa85   :  { %v3116_v49 = vsel %vm199_vm3, %v2995_v47, 0.0  ;;  %v3762_v47 = vld [vmem:[%s5310_s12 + $0x1] ss:$0 sm:$0xff] }
 0xa86   :  { %v3117_v50 = vadd.f32 %v3116_v49, %v3115_v46 }
 0xa88   :  { %v3119_v54 = vadd.f32 %v3118_v53, %v3117_v50  ;;  %v3064_v37 = vpop.f32.mrf.mxu1 }
 0xa89   :  { %v3041_v57 = vpop.f32.mrf.mxu0  ;;  %v3121_v61 = vsel %vm199_vm3, %v3064_v37, 0.0 }
 0xa8a   :  { %v3132_v56 = vadd.f32 %v3760_v51, %v3119_v54  ;;  %v3120_v60 = vsel %vm199_vm3, %v3041_v57, 0.0 }
 0xa8b   :  { %v3122_v0 = vadd.f32 %v3121_v61, %v3120_v60 }
 0xa8c   :  { %v3134_v58 = vadd.f32 %v3132_v56, %v4747_v26  ;;  %v3087_v59 = vpop.f32.mrf.mxu2 }
 0xa8d   :  { %v3123_v63 = vsel %vm199_vm3, %v3087_v59, 0.0 }
 0xa8e   :  { %v3140_v62 = vsel %vm199_vm3, %v3134_v58, 0.0  ;;  %v3124_v1 = vadd.f32 %v3123_v63, %v3122_v0  ;;  %v3677_v63 = vld [vmem:[%s5313_s15 + $0x88] sm:$0xff]  ;;  %v3676_v0 = vld [vmem:[%s5313_s15 + $0x80] sm:$0xff] }
 0xa8f   :  { %3141 = vadd.xlane.f32.xlu2 %v3140_v62  ;;  %v3678_v62 = vld [vmem:[%s5313_s15 + $0x90] sm:$0xff] }
 0xa90   :  { %3294 = vmatpush.msrb.mxu2 %v3678_v62 }
 0xa92   :  { %3295 = vmatpush.msrb.mxu2 %v3677_v63 }
 0xa93   :  { %v3110_v2 = vpop.f32.mrf.mxu3 }
 0xa94   :  { %v3125_v3 = vsel %vm199_vm3, %v3110_v2, 0.0  ;;  %3296 = vmatpush.msrb.mxu2 %v3676_v0  ;;  %v3690_v2 = vld [vmem:[%s5313_s15 + $0xf0] sm:$0xff] }
 0xa95   :  { %v3126_v4 = vadd.f32 %v3125_v3, %v3124_v1  ;;  %v3691_v1 = vld [vmem:[%s5313_s15 + $0xf8] sm:$0xff]  ;;  %v3689_v3 = vld [vmem:[%s5313_s15 + $0xe8] sm:$0xff] }
 0xa96   :  { %3312 = vmatpush.msrb.mxu3 %v3691_v1 }
 0xa97   :  { %v3133_v5 = vadd.f32 %v3760_v51, %v3126_v4  ;;  %v3688_v4 = vld [vmem:[%s5313_s15 + $0xe0] sm:$0xff] }
 0xa98   :  { %3313 = vmatpush.msrb.mxu3 %v3690_v2 }
 0xa99   :  { %v3135_v6 = vadd.f32 %v3133_v5, %v4807_v55  ;;  %v3687_v5 = vld [vmem:[%s5313_s15 + $0xd8] sm:$0xff] }
 0xa9a   :  { %3314 = vmatpush.msrb.mxu3 %v3689_v3 }
 0xa9b   :  { %v3143_v7 = vsel %vm199_vm3, %v3135_v6, 0.0 }
 0xa9c   :  { %3144 = vadd.xlane.f32.xlu0 %v3143_v7  ;;  %3315 = vmatpush.msrb.mxu3 %v3688_v4  ;;  %v3685_v7 = vld [vmem:[%s5313_s15 + $0xc8] sm:$0xff] }
 0xa9e   :  { %3316 = vmatpush.msrb.mxu3 %v3687_v5 }
 0xb02   :  { %v3142_v52 = vpop.xlane.xlu2 %3141 }
 0xb03   :  { %v3146_v8 = vmul.f32 %v3142_v52, %v4524_v15  ;;  %v3684_v52 = vld [vmem:[%s5313_s15 + $0xc0] sm:$0xff] }
 0xb05   :  { %v3148_v9 = vsub.f32 %v3134_v58, %v3146_v8  ;;  %v3763_v8 = vld [vmem:[%s5312_s14 + $0x1] ss:$0 sm:$0xff] }
 0xb07   :  { %v3150_v10 = vmul.f32 %v3148_v9, %v3148_v9 }
 0xb09   :  { %v3152_v11 = vsel %vm199_vm3, %v3150_v10, 0.0 }
 0xb0a   :  { %3153 = vadd.xlane.f32.xlu1 %v3152_v11 }
 0xb0f   :  { %v3145_v12 = vpop.xlane.xlu0 %3144 }
 0xb10   :  { %v3147_v13 = vmul.f32 %v3145_v12, %v4524_v15 }
 0xb12   :  { %v5179_v14 = vsub.f32 %v3135_v6, %v3147_v13  ;;  %v3686_v6 = vld [vmem:[%s5313_s15 + $0xd0] sm:$0xff] }
 0xb13   :  { %3317 = vmatpush.msrb.mxu3 %v3686_v6 }
 0xb14   :  { %v3151_v16 = vmul.f32 %v5179_v14, %v5179_v14 }
 0xb15   :  { %3318 = vmatpush.msrb.mxu3 %v3685_v7 }
 0xb16   :  { %v3155_v17 = vsel %vm199_vm3, %v3151_v16, 0.0  ;;  %v3764_v16 = vld [vmem:[%s5314_s16 + $0x1] ss:$0 sm:$0xff] }
 0xb17   :  { %3156 = vadd.xlane.f32.xlu2 %v3155_v17  ;;  %3319 = vmatpush.msrb.mxu3 %v3684_v52 }
 0xb7d   :  { %v3154_v21 = vpop.xlane.xlu1 %3153 }
 0xb7e   :  { %v3158_v22 = vmul.f32 %v3154_v21, %v4524_v15 }
 0xb80   :  { %v3160_v23 = vadd.f32 1e-05, %v3158_v22 }
 0xb82   :  { %3841 = vrsqrt.f32 %v3160_v23  ;;  %vm3168_vm4 = vweird.f32 %v3160_v23 }
 0xb88   :  { %v3842_v31 = vpop.eup %3841 }
 0xb89   :  { %v3163_v32 = vmul.f32 %v3842_v31, %v3160_v23  ;;  %vm3169_vm0 = vweird.f32 %v3842_v31 }
 0xb8a   :  { %v3157_v34 = vpop.xlane.xlu2 %3156  ;;  %vm3170_vm5 = vmor %vm3168_vm4, %vm3169_vm0 }
 0xb8b   :  { %v3164_v35 = vmul.f32 %v3842_v31, %v3163_v32  ;;  %v3159_v36 = vmul.f32 %v3157_v34, %v4524_v15 }
 0xb8d   :  { %v3165_v39 = vmul.f32 0.5, %v3164_v35  ;;  %v3161_v40 = vadd.f32 1e-05, %v3159_v36 }
 0xb8f   :  { %v3166_v42 = vsub.f32 1.5, %v3165_v39  ;;  %3843 = vrsqrt.f32 %v3161_v40  ;;  %vm3178_vm7 = vweird.f32 %v3161_v40 }
 0xb91   :  { %v3167_v43 = vmul.f32 %v3842_v31, %v3166_v42 }
 0xb93   :  { %v3171_v46 = vsel %vm3170_vm5, %v3842_v31, %v3167_v43 }
 0xb94   :  { %v3182_v48 = vmul.f32 %v3171_v46, %v3148_v9 }
 0xb95   :  { %v3844_v49 = vpop.eup %3843 }
 0xb96   :  { %v3187_v50 = vmul.f32 %v3761_v44, %v3182_v48  ;;  %v3173_v51 = vmul.f32 %v3844_v49, %v3161_v40  ;;  %vm3179_vm6 = vweird.f32 %v3844_v49 }
 0xb97   :  { %vm3180_vm8 = vmor %vm3178_vm7, %vm3179_vm6 }
 0xb98   :  { %v3192_v53 = vadd.f32 %v3762_v47, %v3187_v50  ;;  %v3174_v54 = vmul.f32 %v3844_v49, %v3173_v51 }
 0xb9a   :  { %v3175_v56 = vmul.f32 0.5, %v3174_v54  ;;  %3674 = vmatmul.msk.f32.vlgmr.msra.gmra.mxu0 %vm199_vm3, %v3192_v53 }
 0xb9c   :  { %v3176_v57 = vsub.f32 1.5, %v3175_v56 }
 0xb9e   :  { %v3177_v37 = vmul.f32 %v3844_v49, %v3176_v57 }
 0xba0   :  { %v3181_v58 = vsel %vm3180_vm8, %v3844_v49, %v3177_v37  ;;  %v3765_v49 = vld [vmem:[%s5315_s17 + $0x1] ss:$0 sm:$0xff]  ;;  %s3887_s17 = smov [#allocation2]  }
 0xba1   :  { %v3183_v59 = vmul.f32 %v3181_v58, %v5179_v14 }
 0xba3   :  { %v3188_v60 = vmul.f32 %v3761_v44, %v3183_v59 }
 0xba5   :  { %v3193_v61 = vadd.f32 %v3762_v47, %v3188_v60 }
 0xba7   :  { %3675 = vmatmul.msk.f32.vlgmr.msra.gmra.mxu1 %vm199_vm3, %v3193_v61 }
 0xc17   :  { %v3228_v9 = vpop.f32.mrf.mxu0 }
 0xc18   :  { %v3229_v10 = vadd.f32 %v3763_v8, %v3228_v9 }
 0xc1a   :  { %v3254_v11 = vmax.f32 %v3229_v10, 0.0 }
 0xc1c   :  { %3693 = vmatmul.msk.f32.vlgmr.msrb.gmra.mxu2 %vm1651_vm11, %v3254_v11 }
 0xc24   :  { %v3251_v12 = vpop.f32.mrf.mxu1 }
 0xc25   :  { %v3252_v13 = vadd.f32 %v3763_v8, %v3251_v12 }
 0xc27   :  { %v3255_v14 = vmax.f32 %v3252_v13, 0.0 }
 0xc29   :  { %3694 = vmatmul.msk.f32.vlgmr.msrb.gmra.mxu3 %vm1651_vm11, %v3255_v14 }
 0xc9f   :  { %v3298_v17 = vpop.f32.mrf.mxu2 }
 0xca0   :  { %v3299_v18 = vadd.f32 %v3764_v16, %v3298_v17 }
 0xca2   :  { %v3324_v19 = vadd.f32 %v3299_v18, %v3192_v53  ;;  %v3766_v53 = vld [vmem:[%s5316_s18 + $0x1] ss:$0 sm:$0xff]  ;;  %s3400_s18 = sshll.u32 %s3887_s17, 4  ;;  %s3401_s18 = int_to_ptr.vmem [resolvable:$true] %s3400_s18 }
 0xca4   :  { %v3330_v45 = vsel %vm199_vm3, %v3324_v19, 0.0 }
 0xca5   :  { %3331 = vadd.xlane.f32.xlu0 %v3330_v45 }
 0xcac   :  { %v3321_v20 = vpop.f32.mrf.mxu3 }
 0xcad   :  { %v3322_v21 = vadd.f32 %v3764_v16, %v3321_v20 }
 0xcaf   :  { %v3325_v22 = vadd.f32 %v3322_v21, %v3193_v61 }
 0xcb1   :  { %v3333_v23 = vsel %vm199_vm3, %v3325_v22, 0.0 }
 0xcb2   :  { %3334 = vadd.xlane.f32.xlu1 %v3333_v23 }
 0xd18   :  { %v3332_v24 = vpop.xlane.xlu0 %3331 }
 0xd19   :  { %v3336_v25 = vmul.f32 %v3332_v24, %v4524_v15 }
 0xd1b   :  { %v3338_v27 = vsub.f32 %v3324_v19, %v3336_v25 }
 0xd1d   :  { %v3340_v28 = vmul.f32 %v3338_v27, %v3338_v27 }
 0xd1f   :  { %v3342_v29 = vsel %vm199_vm3, %v3340_v28, 0.0 }
 0xd20   :  { %3343 = vadd.xlane.f32.xlu2 %v3342_v29 }
 0xd25   :  { %v3335_v30 = vpop.xlane.xlu1 %3334 }
 0xd26   :  { %v3337_v31 = vmul.f32 %v3335_v30, %v4524_v15 }
 0xd28   :  { %v3339_v32 = vsub.f32 %v3325_v22, %v3337_v31 }
 0xd2a   :  { %v3341_v33 = vmul.f32 %v3339_v32, %v3339_v32 }
 0xd2c   :  { %v3345_v34 = vsel %vm199_vm3, %v3341_v33, 0.0 }
 0xd2d   :  { %3346 = vadd.xlane.f32.xlu0 %v3345_v34 }
 0xd93   :  { %v3344_v35 = vpop.xlane.xlu2 %3343 }
 0xd94   :  { %v3348_v36 = vmul.f32 %v3344_v35, %v4524_v15 }
 0xd96   :  { %v3350_v38 = vadd.f32 1e-05, %v3348_v36 }
 0xd98   :  { %3845 = vrsqrt.f32 %v3350_v38  ;;  %vm3358_vm10 = vweird.f32 %v3350_v38 }
 0xd9e   :  { %v3846_v39 = vpop.eup %3845 }
 0xd9f   :  { %v3353_v40 = vmul.f32 %v3846_v39, %v3350_v38  ;;  %vm3359_vm9 = vweird.f32 %v3846_v39 }
 0xda0   :  { %v3347_v41 = vpop.xlane.xlu0 %3346  ;;  %vm3360_vm12 = vmor %vm3358_vm10, %vm3359_vm9 }
 0xda1   :  { %v3354_v42 = vmul.f32 %v3846_v39, %v3353_v40  ;;  %v3349_v43 = vmul.f32 %v3347_v41, %v4524_v15 }
 0xda3   :  { %v3355_v44 = vmul.f32 0.5, %v3354_v42  ;;  %v3351_v46 = vadd.f32 1e-05, %v3349_v43 }
 0xda5   :  { %v3356_v47 = vsub.f32 1.5, %v3355_v44  ;;  %3847 = vrsqrt.f32 %v3351_v46  ;;  %vm3368_vm14 = vweird.f32 %v3351_v46 }
 0xda7   :  { %v3357_v48 = vmul.f32 %v3846_v39, %v3356_v47 }
 0xda9   :  { %v3361_v50 = vsel %vm3360_vm12, %v3846_v39, %v3357_v48 }
 0xdaa   :  { %v3372_v51 = vmul.f32 %v3361_v50, %v3338_v27 }
 0xdab   :  { %v3848_v54 = vpop.eup %3847 }
 0xdac   :  { %v3363_v15 = vmul.f32 %v3848_v54, %v3351_v46  ;;  %v3377_v56 = vmul.f32 %v3765_v49, %v3372_v51  ;;  %vm3369_vm13 = vweird.f32 %v3848_v54 }
 0xdad   :  { %vm3370_vm15 = vmor %vm3368_vm14, %vm3369_vm13 }
 0xdae   :  { %v3364_v57 = vmul.f32 %v3848_v54, %v3363_v15  ;;  %v3382_v37 = vadd.f32 %v3766_v53, %v3377_v56 }
 0xdb0   :  { %v3365_v58 = vmul.f32 0.5, %v3364_v57  ;;  %3386 = vrot.lane.b32.xlu1 %v3382_v37, %s3886_s24 }
 0xdb2   :  { %v3366_v59 = vsub.f32 1.5, %v3365_v58 }
 0xdb4   :  { %v3367_v60 = vmul.f32 %v3848_v54, %v3366_v59 }
 0xdb6   :  { %v3371_v61 = vsel %vm3370_vm15, %v3848_v54, %v3367_v60 }
 0xdb7   :  { %v3373_v62 = vmul.f32 %v3371_v61, %v3339_v32 }
 0xdb9   :  { %v3378_v63 = vmul.f32 %v3765_v49, %v3373_v62 }
 0xdbb   :  { %v3383_v0 = vadd.f32 %v3766_v53, %v3378_v63 }
 0xdbd   :  { %3388 = vrot.lane.b32.xlu2 %v3383_v0, %s3886_s24 }
 0xe17   :  { %v3389_v1 = vpop.permute.xlu2 %3388 }
 0xe18   :  { %v3393_v2 = vsel %vm199_vm3, %v4807_v55, %v3389_v1 }
 0xe19   :  { %3395 = vst.msk [vmem:[#allocation2 + $0x8] sm:$0xff] %vm1651_vm11, %v3393_v2 }
 0xe22   :  { %v3387_v3 = vpop.permute.xlu1 %3386 }
 0xe23   :  { %v3392_v4 = vsel %vm199_vm3, %v4747_v26, %v3387_v3 }
 0xe24   :  { %3394 = vst.msk [vmem:[#allocation2] sm:$0xff] %vm1651_vm11, %v3392_v4 }
 0xe25   :  { %3408 = dma.vmem_to_hbm [thread:$0]  %s3401_s18, 256, %s3403_s7, [#allocation3], %s3888_s27, %s3888_s27, %s3889_s8  }
 0xe26   :  { %3881 = dma.done.wait [#allocation3], 256  }
 0xe27   :  { %3882 = vsyncadd [#allocation3], 4294967040 }
 0xe28   :  { %3413 = vsyncpa [#allocation3], 1 }

</bundles_post_ra>
